<compile_context>
chip_gen: v7x
topology: tpu7x:2x2x1
jax: 0.10.0
libtpu: 0.0.40
codegen_flags: <defaults>
</compile_context>

<pallas_src>
import functools

import numpy as np
import jax
import jax.numpy as jnp
from jax.experimental import pallas as pl
from jax.experimental.pallas import tpu as pltpu


# ----------------------------------------------------------------------------
# utils
# ----------------------------------------------------------------------------
def to_multiple(x, multiple):
    """Same semantics as the reference `to_multiple` (float modulo)."""
    if x % multiple == 0:
        return x
    return x + multiple - x % multiple


# ----------------------------------------------------------------------------
# Fused ConvCNP forward kernel (one grid step == one batch element)
# ----------------------------------------------------------------------------
def _convcnp_kernel(dims_ref, enc_inv_ref, head_inv_ref, head_w_ref, head_b_ref,
                    x_ref, y_ref, xo_ref, xg_ref, enc_w_ref, enc_b_ref,
                    *rest, n_layers, K):
    # SMEM scalars:
    #   dims_ref    : (1,)  int32  -- number of VALID grid points M (<= M_pad)
    #   enc_inv_ref : (2,)  f32    -- 1/scale^2 for encoder density/value chans
    #   head_inv_ref: (2C,) f32    -- 1/scale^2 for [mean | sigma] channels
    #   head_w_ref  : (2C,) f32    -- Linear(C->1) weights for [mean | sigma]
    #   head_b_ref  : (2,)  f32    -- Linear biases        for [mean | sigma]
    # VMEM:
    #   x_ref  : (1, N, 1)   observation locations
    #   y_ref  : (1, N, 1)   observation values
    #   xo_ref : (1, Mo, 1)  target locations
    #   xg_ref : (1, M_pad)  grid locations (zeros in the padded tail)
    #   enc_w_ref : (C0, 2), enc_b_ref : (C0, 1)
    #   rest   : per conv layer (Wt (Cout, K*Cin), b (Cout, 1)),
    #            then mean_ref (1, Mo, 1), sigma_ref (1, Mo, 1)
    rho_refs = rest[:2 * n_layers]
    mean_ref, sigma_ref = rest[2 * n_layers], rest[2 * n_layers + 1]

    m_pad = xg_ref.shape[1]
    m_valid = dims_ref[0]
    pad = (K - 1) // 2

    # lane mask for valid (un-padded) grid columns
    col = jax.lax.broadcasted_iota(jnp.int32, (1, m_pad), 1)
    mask = (col < m_valid).astype(jnp.float32)                    # (1, M_pad)

    # ------------------ encoder: ConvDeepSet onto the grid -------------------
    xg = xg_ref[...]                                              # (1, M_pad)
    xc = x_ref[0]                                                 # (N, 1)
    yc = y_ref[0]                                                 # (N, 1)
    d = (xg - xc) ** 2                                            # (N, M_pad)
    wt0 = jnp.exp(-0.5 * d * enc_inv_ref[0])                      # density chan
    wt1 = jnp.exp(-0.5 * d * enc_inv_ref[1])                      # value chan
    y0 = jnp.sum(wt0, axis=0, keepdims=True)                      # (1, M_pad)
    y1 = jnp.sum(wt1 * yc, axis=0, keepdims=True)                 # (1, M_pad)
    y1n = y1 / (y0 + 1e-8)                                        # density norm

    w0 = enc_w_ref[:, 0:1]                                        # (C0, 1)
    w1 = enc_w_ref[:, 1:2]                                        # (C0, 1)
    h = w0 * y0 + w1 * y1n + enc_b_ref[...]                       # (C0, M_pad)
    a = (1.0 / (1.0 + jnp.exp(-h))) * mask                        # sigmoid + pad->0

    # ------------------ rho: tap-fused conv layers on the MXU ----------------
    for li in range(n_layers):
        w_ref = rho_refs[2 * li]                                  # (Cout, K*Cin)
        b_ref = rho_refs[2 * li + 1]                              # (Cout, 1)
        cin = a.shape[0]
        z = jnp.zeros((cin, pad), jnp.float32)
        a_halo = jnp.concatenate([z, a, z], axis=1)               # (Cin, M_pad+K-1)
        # im2col: stack the K shifted views along sublanes (Cin is 8-aligned)
        rhs = jnp.concatenate([a_halo[:, k:k + m_pad] for k in range(K)], axis=0)
        out = jnp.dot(w_ref[...], rhs,
                      preferred_element_type=jnp.float32) + b_ref[...]
        if li < n_layers - 1:
            out = jnp.maximum(out, 0.0)
        a = out * mask                                            # (Cout, M_pad)

    # ------------------ fused mean / sigma heads (shared distances) ----------
    c_head = a.shape[0]
    xo = xo_ref[0]                                                # (Mo, 1)
    d2 = (xg - xo) ** 2                                           # (Mo, M_pad)
    mean_acc = jnp.zeros((xo.shape[0], 1), jnp.float32)
    sig_acc = jnp.zeros((xo.shape[0], 1), jnp.float32)
    for c in range(c_head):
        a_c = a[c:c + 1, :]                                       # (1, M_pad)
        wt_m = jnp.exp(-0.5 * d2 * head_inv_ref[c])               # (Mo, M_pad)
        wt_s = jnp.exp(-0.5 * d2 * head_inv_ref[c_head + c])
        mean_acc = mean_acc + head_w_ref[c] * jnp.sum(
            wt_m * a_c, axis=1, keepdims=True)
        sig_acc = sig_acc + head_w_ref[c_head + c] * jnp.sum(
            wt_s * a_c, axis=1, keepdims=True)
    mean_acc = mean_acc + head_b_ref[0]
    sig_acc = sig_acc + head_b_ref[1]
    # Softplus (threshold 20, as in torch), inf-safe in the unselected branch
    sig_acc = jnp.where(sig_acc > 20.0, sig_acc,
                        jnp.log(1.0 + jnp.exp(jnp.minimum(sig_acc, 20.0))))

    mean_ref[0] = mean_acc                                        # (Mo, 1)
    sigma_ref[0] = sig_acc


# ----------------------------------------------------------------------------
# ConvCNP forward (glue)
# ----------------------------------------------------------------------------
def convcnp_forward(params, x, y, x_out, points_per_unit, multiplier):
    # x: (B, N, 1), y: (B, N, 1), x_out: (B, Mo, 1)
    # Host-side min/max mirrors the reference's .cpu().numpy() grid sizing.
    # TODO(synk): the host sync here is inherited from the PyTorch reference;
    # the kernel itself only recompiles per 128-bucket of the grid length.
    x_min = min(float(jnp.min(x)), float(jnp.min(x_out)), -2.0) - 0.1
    x_max = max(float(jnp.max(x)), float(jnp.max(x_out)), 2.0) + 0.1
    num_points = int(to_multiple(points_per_unit * (x_max - x_min), multiplier))

    # Pad the grid to a lane-dense multiple of 128; the valid length is a
    # runtime SMEM scalar, so any grid in the same bucket reuses the compile.
    m_pad = int(to_multiple(num_points, 128))
    x_grid = jnp.linspace(x_min, x_max, num_points, dtype=jnp.float32)
    xg_row = jnp.zeros((1, m_pad), jnp.float32).at[0, :num_points].set(x_grid)

    B, N, _ = x.shape
    Mo = x_out.shape[1]

    # ---- parameter re-layout for the lane-dense kernel ----
    enc_w_t = jnp.transpose(params['enc_w'])                      # (C0, 2)
    enc_b_c = params['enc_b'].reshape(-1, 1)                      # (C0, 1)
    C0 = enc_w_t.shape[0]

    rho_args, rho_specs = [], []
    n_layers = len(params['rho'])
    K = params['rho'][0][0].shape[0]
    for (w, b) in params['rho']:
        k_, cin, cout = w.shape
        w_t = jnp.transpose(w, (2, 0, 1)).reshape(cout, k_ * cin)  # (Cout, K*Cin)
        b_c = b.reshape(cout, 1)
        rho_args += [w_t, b_c]
        rho_specs += [pl.BlockSpec((cout, k_ * cin), lambda i: (0, 0)),
                      pl.BlockSpec((cout, 1), lambda i: (0, 0))]

    dims = jnp.array([num_points], jnp.int32)
    enc_inv = 1.0 / (params['enc_scales'] ** 2)
    head_inv = jnp.concatenate([1.0 / (params['mean_scales'] ** 2),
                                1.0 / (params['sigma_scales'] ** 2)])
    head_w = jnp.concatenate([params['mean_w'], params['sigma_w']])
    head_b = jnp.concatenate([params['mean_b'], params['sigma_b']])

    kern = functools.partial(_convcnp_kernel, n_layers=n_layers, K=K)
    smem = pl.BlockSpec(memory_space=pltpu.MemorySpace.SMEM)

    mean, sigma = pl.pallas_call(
        kern,
        out_shape=(jax.ShapeDtypeStruct((B, Mo, 1), jnp.float32),
                   jax.ShapeDtypeStruct((B, Mo, 1), jnp.float32)),
        grid=(B,),
        in_specs=[
            smem, smem, smem, smem, smem,                          # scalars
            pl.BlockSpec((1, N, 1), lambda i: (i, 0, 0)),          # x
            pl.BlockSpec((1, N, 1), lambda i: (i, 0, 0)),          # y
            pl.BlockSpec((1, Mo, 1), lambda i: (i, 0, 0)),         # x_out
            pl.BlockSpec((1, m_pad), lambda i: (0, 0)),            # grid (row)
            pl.BlockSpec((C0, 2), lambda i: (0, 0)),               # enc W^T
            pl.BlockSpec((C0, 1), lambda i: (0, 0)),               # enc b
        ] + rho_specs,
        out_specs=(pl.BlockSpec((1, Mo, 1), lambda i: (i, 0, 0)),
                   pl.BlockSpec((1, Mo, 1), lambda i: (i, 0, 0))),
        compiler_params=pltpu.CompilerParams(
            dimension_semantics=("parallel",),          # v7x: split batch on 2 TCs
            vmem_limit_bytes=32 * 1024 * 1024),
    )(dims, enc_inv, head_inv, head_w, head_b,
      x, y, x_out, xg_row, enc_w_t, enc_b_c, *rho_args)
    return mean, sigma


# ----------------------------------------------------------------------------
# Pure-JAX reference (mirrors the PyTorch math) for verification
# ----------------------------------------------------------------------------
def _rbf(dists, scales):
    return jnp.exp(-0.5 * dists[..., None] / scales[None, None, None, :] ** 2)


def ref_forward(params, x, y, x_out, points_per_unit, multiplier):
    x_min = min(float(jnp.min(x)), float(jnp.min(x_out)), -2.0) - 0.1
    x_max = max(float(jnp.max(x)), float(jnp.max(x_out)), 2.0) + 0.1
    num_points = int(to_multiple(points_per_unit * (x_max - x_min), multiplier))
    x_grid = jnp.linspace(x_min, x_max, num_points, dtype=jnp.float32)
    B, N, _ = x.shape
    xg = jnp.broadcast_to(x_grid[None, :, None], (B, num_points, 1))

    # encoder (ConvDeepSet with density channel)
    dists = (x - jnp.transpose(xg, (0, 2, 1))) ** 2                # (B, N, M)
    wt = _rbf(dists, params['enc_scales'])                         # (B, N, M, 2)
    y_cat = jnp.concatenate([jnp.ones((B, N, 1), jnp.float32), y], axis=2)
    y_out = jnp.sum(y_cat[:, :, None, :] * wt, axis=1)             # (B, M, 2)
    dens, conv = y_out[..., :1], y_out[..., 1:]
    y_out = jnp.concatenate([dens, conv / (dens + 1e-8)], axis=-1)
    h = jax.nn.sigmoid(y_out @ params['enc_w'] + params['enc_b'])

    # rho
    a = h
    n_layers = len(params['rho'])
    for i, (w, b) in enumerate(params['rho']):
        K = w.shape[0]
        pad = (K - 1) // 2
        ap = jnp.pad(a, ((0, 0), (pad, pad), (0, 0)))
        out = jnp.zeros((B, a.shape[1], w.shape[2]), jnp.float32)
        for k in range(K):
            out = out + ap[:, k:k + a.shape[1], :] @ w[k]
        out = out + b
        a = jnp.maximum(out, 0.0) if i < n_layers - 1 else out

    # final layers
    def final(scales, wv, bv):
        d = (xg - jnp.transpose(x_out, (0, 2, 1))) ** 2            # (B, M, Mo)
        wtf = _rbf(d, scales)                                      # (B, M, Mo, C)
        yo = jnp.sum(a[:, :, None, :] * wtf, axis=1)               # (B, Mo, C)
        return yo @ wv[:, None] + bv                               # (B, Mo, 1)

    mean = final(params['mean_scales'], params['mean_w'], params['mean_b'])
    pre = final(params['sigma_scales'], params['sigma_w'], params['sigma_b'])
    sigma = jnp.where(pre > 20.0, pre,
                      jnp.log(1.0 + jnp.exp(jnp.minimum(pre, 20.0))))
    return mean, sigma


# ----------------------------------------------------------------------------
# deterministic parameter init (shapes follow the module __init__)
# ----------------------------------------------------------------------------
def init_params(key, points_per_unit, rho_in=8, rho_out=8):
    init_ls = 2.0 / points_per_unit
    ks = jax.random.split(key, 8)

    # encoder: length scales exp(log(l)) = l ; Linear(2 -> rho_in)
    enc_scales = jnp.full((2,), init_ls, jnp.float32)
    enc_std = np.sqrt(2.0 / (2 + rho_in))
    enc_w = enc_std * jax.random.normal(ks[0], (2, rho_in), jnp.float32)
    enc_b = jnp.zeros((1, rho_in), jnp.float32)

    # rho (SimpleConv): Conv1d weights stored as (K=5, Cin, Cout)
    chans = [rho_in, 16, 32, 16, rho_out]
    rho = []
    for i in range(4):
        cin, cout = chans[i], chans[i + 1]
        wstd = np.sqrt(1.0 / (cin * 5))
        w = wstd * jax.random.normal(ks[1 + i], (5, cin, cout), jnp.float32)
        b = jnp.zeros((1, cout), jnp.float32)
        rho.append((w, b))

    # final layers: Linear(rho_out -> 1), per-channel length scales = init_ls
    fstd = np.sqrt(2.0 / (rho_out + 1))
    mean_w = fstd * jax.random.normal(ks[5], (rho_out,), jnp.float32)
    sigma_w = fstd * jax.random.normal(ks[6], (rho_out,), jnp.float32)

    return dict(
        enc_scales=enc_scales, enc_w=enc_w, enc_b=enc_b,
        rho=rho,
        mean_scales=jnp.full((rho_out,), init_ls, jnp.float32),
        mean_w=mean_w, mean_b=jnp.zeros((1,), jnp.float32),
        sigma_scales=jnp.full((rho_out,), init_ls, jnp.float32),
        sigma_w=sigma_w, sigma_b=jnp.zeros((1,), jnp.float32),
    )


# ----------------------------------------------------------------------------
if __name__ == "__main__":
    key = jax.random.PRNGKey(0)
    B, N, Mo = 2, 8, 8
    points_per_unit = 16
    multiplier = 1  # rho.num_halving_layers == 0  ->  2**0

    kx, ky, kxo, kp = jax.random.split(key, 4)
    x = jax.random.uniform(kx, (B, N, 1), jnp.float32, -2.0, 2.0)
    y = jax.random.normal(ky, (B, N, 1), jnp.float32)
    x_out = jax.random.uniform(kxo, (B, Mo, 1), jnp.float32, -2.0, 2.0)

    params = init_params(kp, points_per_unit)

    mean, sigma = convcnp_forward(params, x, y, x_out, points_per_unit, multiplier)
    (mean, sigma) = jax.block_until_ready((mean, sigma))

    mean_ref, sigma_ref = ref_forward(params, x, y, x_out, points_per_unit, multiplier)

    assert mean.shape == (B, Mo, 1) and sigma.shape == (B, Mo, 1)
    np.testing.assert_allclose(np.asarray(mean), np.asarray(mean_ref),
                               rtol=1e-2, atol=1e-2)
    np.testing.assert_allclose(np.asarray(sigma), np.asarray(sigma_ref),
                               rtol=1e-2, atol=1e-2)
    print("KERNEL_OK")
</pallas_src>

<mosaic_0001>
module attributes {stable_mosaic.version = 11 : i64} {
  func.func @_convcnp_kernel(%arg0: i32, %arg1: memref<1xi32, #tpu.memory_space<smem>>, %arg2: memref<2xf32, #tpu.memory_space<smem>>, %arg3: memref<16xf32, #tpu.memory_space<smem>>, %arg4: memref<16xf32, #tpu.memory_space<smem>>, %arg5: memref<2xf32, #tpu.memory_space<smem>>, %arg6: memref<1x8x1xf32, #tpu.memory_space<vmem>>, %arg7: memref<1x8x1xf32, #tpu.memory_space<vmem>>, %arg8: memref<1x8x1xf32, #tpu.memory_space<vmem>>, %arg9: memref<1x128xf32, #tpu.memory_space<vmem>>, %arg10: memref<8x2xf32, #tpu.memory_space<vmem>>, %arg11: memref<8x1xf32, #tpu.memory_space<vmem>>, %arg12: memref<16x40xf32, #tpu.memory_space<vmem>>, %arg13: memref<16x1xf32, #tpu.memory_space<vmem>>, %arg14: memref<32x80xf32, #tpu.memory_space<vmem>>, %arg15: memref<32x1xf32, #tpu.memory_space<vmem>>, %arg16: memref<16x160xf32, #tpu.memory_space<vmem>>, %arg17: memref<16x1xf32, #tpu.memory_space<vmem>>, %arg18: memref<8x80xf32, #tpu.memory_space<vmem>>, %arg19: memref<8x1xf32, #tpu.memory_space<vmem>>, %arg20: memref<1x8x1xf32, #tpu.memory_space<vmem>>, %arg21: memref<1x8x1xf32, #tpu.memory_space<vmem>>) attributes {dimension_semantics = [#tpu.dimension_semantics<parallel>], iteration_bounds = array<i64: 2>, scalar_prefetch = 0 : i64, scratch_operands = 0 : i64, tpu.core_type = #tpu.core_type<tc>, window_params = [{transform_indices = @transform_0, window_bounds = array<i64: 1>}, {transform_indices = @transform_1, window_bounds = array<i64: 2>}, {transform_indices = @transform_2, window_bounds = array<i64: 16>}, {transform_indices = @transform_3, window_bounds = array<i64: 16>}, {transform_indices = @transform_4, window_bounds = array<i64: 2>}, {transform_indices = @transform_5, window_bounds = array<i64: 1, 8, 1>}, {transform_indices = @transform_6, window_bounds = array<i64: 1, 8, 1>}, {transform_indices = @transform_7, window_bounds = array<i64: 1, 8, 1>}, {pipeline_mode = #tpu.pipeline_mode<synchronous>, transform_indices = @transform_8, window_bounds = array<i64: 1, 128>}, {pipeline_mode = #tpu.pipeline_mode<synchronous>, transform_indices = @transform_9, window_bounds = array<i64: 8, 2>}, {pipeline_mode = #tpu.pipeline_mode<synchronous>, transform_indices = @transform_10, window_bounds = array<i64: 8, 1>}, {pipeline_mode = #tpu.pipeline_mode<synchronous>, transform_indices = @transform_11, window_bounds = array<i64: 16, 40>}, {pipeline_mode = #tpu.pipeline_mode<synchronous>, transform_indices = @transform_12, window_bounds = array<i64: 16, 1>}, {pipeline_mode = #tpu.pipeline_mode<synchronous>, transform_indices = @transform_13, window_bounds = array<i64: 32, 80>}, {pipeline_mode = #tpu.pipeline_mode<synchronous>, transform_indices = @transform_14, window_bounds = array<i64: 32, 1>}, {pipeline_mode = #tpu.pipeline_mode<synchronous>, transform_indices = @transform_15, window_bounds = array<i64: 16, 160>}, {pipeline_mode = #tpu.pipeline_mode<synchronous>, transform_indices = @transform_16, window_bounds = array<i64: 16, 1>}, {pipeline_mode = #tpu.pipeline_mode<synchronous>, transform_indices = @transform_17, window_bounds = array<i64: 8, 80>}, {pipeline_mode = #tpu.pipeline_mode<synchronous>, transform_indices = @transform_18, window_bounds = array<i64: 8, 1>}, {transform_indices = @transform_19, window_bounds = array<i64: 1, 8, 1>}, {transform_indices = @transform_20, window_bounds = array<i64: 1, 8, 1>}]} {
    %c0 = arith.constant 0 : index
    %0 = memref.load %arg1[%c0] : memref<1xi32, #tpu.memory_space<smem>>
    %1 = tpu.iota {dimensions = array<i32: 1>} : vector<1x128xi32>
    %2 = vector.broadcast %0 : i32 to vector<1x128xi32>
    %3 = arith.cmpi slt, %1, %2 : vector<1x128xi32>
    %4 = arith.extui %3 : vector<1x128xi1> to vector<1x128xi32>
    %5 = arith.sitofp %4 : vector<1x128xi32> to vector<1x128xf32>
    %c0_0 = arith.constant 0 : index
    %c0_1 = arith.constant 0 : index
    %6 = vector.load %arg9[%c0_0, %c0_1] : memref<1x128xf32, #tpu.memory_space<vmem>>, vector<1x128xf32>
    %c0_2 = arith.constant 0 : index
    %c0_3 = arith.constant 0 : index
    %c0_4 = arith.constant 0 : index
    %7 = vector.load %arg6[%c0_2, %c0_3, %c0_4] : memref<1x8x1xf32, #tpu.memory_space<vmem>>, vector<1x8x1xf32>
    %8 = vector.shape_cast %7 : vector<1x8x1xf32> to vector<8x1xf32>
    %c0_5 = arith.constant 0 : index
    %c0_6 = arith.constant 0 : index
    %c0_7 = arith.constant 0 : index
    %9 = vector.load %arg7[%c0_5, %c0_6, %c0_7] : memref<1x8x1xf32, #tpu.memory_space<vmem>>, vector<1x8x1xf32>
    %10 = vector.shape_cast %9 : vector<1x8x1xf32> to vector<8x1xf32>
    %11 = vector.broadcast %6 : vector<1x128xf32> to vector<8x128xf32>
    %12 = vector.broadcast %8 : vector<8x1xf32> to vector<8x128xf32>
    %13 = arith.subf %11, %12 : vector<8x128xf32>
    %14 = arith.mulf %13, %13 : vector<8x128xf32>
    %cst = arith.constant -5.000000e-01 : f32
    %15 = vector.broadcast %cst : f32 to vector<8x128xf32>
    %16 = arith.mulf %15, %14 : vector<8x128xf32>
    %c0_8 = arith.constant 0 : index
    %17 = memref.load %arg2[%c0_8] : memref<2xf32, #tpu.memory_space<smem>>
    %18 = vector.broadcast %17 : f32 to vector<8x128xf32>
    %19 = arith.mulf %16, %18 : vector<8x128xf32>
    %20 = math.exp %19 : vector<8x128xf32>
    %cst_9 = arith.constant -5.000000e-01 : f32
    %21 = vector.broadcast %cst_9 : f32 to vector<8x128xf32>
    %22 = arith.mulf %21, %14 : vector<8x128xf32>
    %c1 = arith.constant 1 : index
    %23 = memref.load %arg2[%c1] : memref<2xf32, #tpu.memory_space<smem>>
    %24 = vector.broadcast %23 : f32 to vector<8x128xf32>
    %25 = arith.mulf %22, %24 : vector<8x128xf32>
    %26 = math.exp %25 : vector<8x128xf32>
    %cst_10 = arith.constant dense<0.000000e+00> : vector<128xf32>
    %27 = vector.multi_reduction <add>, %20, %cst_10 [0] : vector<8x128xf32> to vector<128xf32>
    %28 = vector.shape_cast %27 : vector<128xf32> to vector<1x128xf32>
    %29 = vector.broadcast %10 : vector<8x1xf32> to vector<8x128xf32>
    %30 = arith.mulf %26, %29 : vector<8x128xf32>
    %cst_11 = arith.constant dense<0.000000e+00> : vector<128xf32>
    %31 = vector.multi_reduction <add>, %30, %cst_11 [0] : vector<8x128xf32> to vector<128xf32>
    %32 = vector.shape_cast %31 : vector<128xf32> to vector<1x128xf32>
    %cst_12 = arith.constant 9.99999993E-9 : f32
    %33 = vector.broadcast %cst_12 : f32 to vector<1x128xf32>
    %34 = arith.addf %28, %33 : vector<1x128xf32>
    %35 = arith.divf %32, %34 : vector<1x128xf32>
    %c0_13 = arith.constant 0 : index
    %c0_14 = arith.constant 0 : index
    %36 = vector.load %arg10[%c0_13, %c0_14] : memref<8x2xf32, #tpu.memory_space<vmem>>, vector<8x1xf32>
    %c0_15 = arith.constant 0 : index
    %c1_16 = arith.constant 1 : index
    %37 = vector.load %arg10[%c0_15, %c1_16] : memref<8x2xf32, #tpu.memory_space<vmem>>, vector<8x1xf32>
    %38 = vector.broadcast %36 : vector<8x1xf32> to vector<8x128xf32>
    %39 = vector.broadcast %28 : vector<1x128xf32> to vector<8x128xf32>
    %40 = arith.mulf %38, %39 : vector<8x128xf32>
    %41 = vector.broadcast %37 : vector<8x1xf32> to vector<8x128xf32>
    %42 = vector.broadcast %35 : vector<1x128xf32> to vector<8x128xf32>
    %43 = arith.mulf %41, %42 : vector<8x128xf32>
    %44 = arith.addf %40, %43 : vector<8x128xf32>
    %c0_17 = arith.constant 0 : index
    %c0_18 = arith.constant 0 : index
    %45 = vector.load %arg11[%c0_17, %c0_18] : memref<8x1xf32, #tpu.memory_space<vmem>>, vector<8x1xf32>
    %46 = vector.broadcast %45 : vector<8x1xf32> to vector<8x128xf32>
    %47 = arith.addf %44, %46 : vector<8x128xf32>
    %cst_19 = arith.constant 0.000000e+00 : f32
    %48 = vector.broadcast %cst_19 : f32 to vector<8x128xf32>
    %49 = arith.subf %48, %47 : vector<8x128xf32>
    %50 = math.exp %49 : vector<8x128xf32>
    %cst_20 = arith.constant 1.000000e+00 : f32
    %51 = vector.broadcast %cst_20 : f32 to vector<8x128xf32>
    %52 = arith.addf %51, %50 : vector<8x128xf32>
    %cst_21 = arith.constant 1.000000e+00 : f32
    %53 = vector.broadcast %cst_21 : f32 to vector<8x128xf32>
    %54 = arith.divf %53, %52 : vector<8x128xf32>
    %55 = vector.broadcast %5 : vector<1x128xf32> to vector<8x128xf32>
    %56 = arith.mulf %54, %55 : vector<8x128xf32>
    %cst_22 = arith.constant 0.000000e+00 : f32
    %57 = vector.broadcast %cst_22 : f32 to vector<8x2xf32>
    %58 = tpu.concatenate %57, %56, %57 in 1 : vector<8x2xf32>, vector<8x128xf32>, vector<8x2xf32> -> vector<8x132xf32>
    %59 = vector.extract_strided_slice %58 {offsets = [0, 0], sizes = [8, 128], strides = [1, 1]} : vector<8x132xf32> to vector<8x128xf32>
    %60 = vector.extract_strided_slice %58 {offsets = [0, 1], sizes = [8, 128], strides = [1, 1]} : vector<8x132xf32> to vector<8x128xf32>
    %61 = vector.extract_strided_slice %58 {offsets = [0, 2], sizes = [8, 128], strides = [1, 1]} : vector<8x132xf32> to vector<8x128xf32>
    %62 = vector.extract_strided_slice %58 {offsets = [0, 3], sizes = [8, 128], strides = [1, 1]} : vector<8x132xf32> to vector<8x128xf32>
    %63 = vector.extract_strided_slice %58 {offsets = [0, 4], sizes = [8, 128], strides = [1, 1]} : vector<8x132xf32> to vector<8x128xf32>
    %64 = tpu.concatenate %59, %60, %61, %62, %63 in 0 : vector<8x128xf32>, vector<8x128xf32>, vector<8x128xf32>, vector<8x128xf32>, vector<8x128xf32> -> vector<40x128xf32>
    %c0_23 = arith.constant 0 : index
    %c0_24 = arith.constant 0 : index
    %65 = vector.load %arg12[%c0_23, %c0_24] : memref<16x40xf32, #tpu.memory_space<vmem>>, vector<16x40xf32>
    %cst_25 = arith.constant dense<0.000000e+00> : vector<16x128xf32>
    %66 = tpu.matmul %65, %64, %cst_25 {dimension_numbers = #tpu.dot_dimension_numbers<[1], [0], [0], [1], [0, 0, 1, 1], [], []>} : vector<16x40xf32>, vector<40x128xf32>, vector<16x128xf32> -> vector<16x128xf32>
    %c0_26 = arith.constant 0 : index
    %c0_27 = arith.constant 0 : index
    %67 = vector.load %arg13[%c0_26, %c0_27] : memref<16x1xf32, #tpu.memory_space<vmem>>, vector<16x1xf32>
    %68 = vector.broadcast %67 : vector<16x1xf32> to vector<16x128xf32>
    %69 = arith.addf %66, %68 : vector<16x128xf32>
    %cst_28 = arith.constant 0.000000e+00 : f32
    %70 = vector.broadcast %cst_28 : f32 to vector<16x128xf32>
    %71 = arith.maximumf %69, %70 : vector<16x128xf32>
    %72 = vector.broadcast %5 : vector<1x128xf32> to vector<16x128xf32>
    %73 = arith.mulf %71, %72 : vector<16x128xf32>
    %cst_29 = arith.constant 0.000000e+00 : f32
    %74 = vector.broadcast %cst_29 : f32 to vector<16x2xf32>
    %75 = tpu.concatenate %74, %73, %74 in 1 : vector<16x2xf32>, vector<16x128xf32>, vector<16x2xf32> -> vector<16x132xf32>
    %76 = vector.extract_strided_slice %75 {offsets = [0, 0], sizes = [16, 128], strides = [1, 1]} : vector<16x132xf32> to vector<16x128xf32>
    %77 = vector.extract_strided_slice %75 {offsets = [0, 1], sizes = [16, 128], strides = [1, 1]} : vector<16x132xf32> to vector<16x128xf32>
    %78 = vector.extract_strided_slice %75 {offsets = [0, 2], sizes = [16, 128], strides = [1, 1]} : vector<16x132xf32> to vector<16x128xf32>
    %79 = vector.extract_strided_slice %75 {offsets = [0, 3], sizes = [16, 128], strides = [1, 1]} : vector<16x132xf32> to vector<16x128xf32>
    %80 = vector.extract_strided_slice %75 {offsets = [0, 4], sizes = [16, 128], strides = [1, 1]} : vector<16x132xf32> to vector<16x128xf32>
    %81 = tpu.concatenate %76, %77, %78, %79, %80 in 0 : vector<16x128xf32>, vector<16x128xf32>, vector<16x128xf32>, vector<16x128xf32>, vector<16x128xf32> -> vector<80x128xf32>
    %c0_30 = arith.constant 0 : index
    %c0_31 = arith.constant 0 : index
    %82 = vector.load %arg14[%c0_30, %c0_31] : memref<32x80xf32, #tpu.memory_space<vmem>>, vector<32x80xf32>
    %cst_32 = arith.constant dense<0.000000e+00> : vector<32x128xf32>
    %83 = tpu.matmul %82, %81, %cst_32 {dimension_numbers = #tpu.dot_dimension_numbers<[1], [0], [0], [1], [0, 0, 1, 1], [], []>} : vector<32x80xf32>, vector<80x128xf32>, vector<32x128xf32> -> vector<32x128xf32>
    %c0_33 = arith.constant 0 : index
    %c0_34 = arith.constant 0 : index
    %84 = vector.load %arg15[%c0_33, %c0_34] : memref<32x1xf32, #tpu.memory_space<vmem>>, vector<32x1xf32>
    %85 = vector.broadcast %84 : vector<32x1xf32> to vector<32x128xf32>
    %86 = arith.addf %83, %85 : vector<32x128xf32>
    %cst_35 = arith.constant 0.000000e+00 : f32
    %87 = vector.broadcast %cst_35 : f32 to vector<32x128xf32>
    %88 = arith.maximumf %86, %87 : vector<32x128xf32>
    %89 = vector.broadcast %5 : vector<1x128xf32> to vector<32x128xf32>
    %90 = arith.mulf %88, %89 : vector<32x128xf32>
    %cst_36 = arith.constant 0.000000e+00 : f32
    %91 = vector.broadcast %cst_36 : f32 to vector<32x2xf32>
    %92 = tpu.concatenate %91, %90, %91 in 1 : vector<32x2xf32>, vector<32x128xf32>, vector<32x2xf32> -> vector<32x132xf32>
    %93 = vector.extract_strided_slice %92 {offsets = [0, 0], sizes = [32, 128], strides = [1, 1]} : vector<32x132xf32> to vector<32x128xf32>
    %94 = vector.extract_strided_slice %92 {offsets = [0, 1], sizes = [32, 128], strides = [1, 1]} : vector<32x132xf32> to vector<32x128xf32>
    %95 = vector.extract_strided_slice %92 {offsets = [0, 2], sizes = [32, 128], strides = [1, 1]} : vector<32x132xf32> to vector<32x128xf32>
    %96 = vector.extract_strided_slice %92 {offsets = [0, 3], sizes = [32, 128], strides = [1, 1]} : vector<32x132xf32> to vector<32x128xf32>
    %97 = vector.extract_strided_slice %92 {offsets = [0, 4], sizes = [32, 128], strides = [1, 1]} : vector<32x132xf32> to vector<32x128xf32>
    %98 = tpu.concatenate %93, %94, %95, %96, %97 in 0 : vector<32x128xf32>, vector<32x128xf32>, vector<32x128xf32>, vector<32x128xf32>, vector<32x128xf32> -> vector<160x128xf32>
    %c0_37 = arith.constant 0 : index
    %c0_38 = arith.constant 0 : index
    %99 = vector.load %arg16[%c0_37, %c0_38] : memref<16x160xf32, #tpu.memory_space<vmem>>, vector<16x160xf32>
    %cst_39 = arith.constant dense<0.000000e+00> : vector<16x128xf32>
    %100 = tpu.matmul %99, %98, %cst_39 {dimension_numbers = #tpu.dot_dimension_numbers<[1], [0], [0], [1], [0, 0, 1, 1], [], []>} : vector<16x160xf32>, vector<160x128xf32>, vector<16x128xf32> -> vector<16x128xf32>
    %c0_40 = arith.constant 0 : index
    %c0_41 = arith.constant 0 : index
    %101 = vector.load %arg17[%c0_40, %c0_41] : memref<16x1xf32, #tpu.memory_space<vmem>>, vector<16x1xf32>
    %102 = vector.broadcast %101 : vector<16x1xf32> to vector<16x128xf32>
    %103 = arith.addf %100, %102 : vector<16x128xf32>
    %cst_42 = arith.constant 0.000000e+00 : f32
    %104 = vector.broadcast %cst_42 : f32 to vector<16x128xf32>
    %105 = arith.maximumf %103, %104 : vector<16x128xf32>
    %106 = vector.broadcast %5 : vector<1x128xf32> to vector<16x128xf32>
    %107 = arith.mulf %105, %106 : vector<16x128xf32>
    %cst_43 = arith.constant 0.000000e+00 : f32
    %108 = vector.broadcast %cst_43 : f32 to vector<16x2xf32>
    %109 = tpu.concatenate %108, %107, %108 in 1 : vector<16x2xf32>, vector<16x128xf32>, vector<16x2xf32> -> vector<16x132xf32>
    %110 = vector.extract_strided_slice %109 {offsets = [0, 0], sizes = [16, 128], strides = [1, 1]} : vector<16x132xf32> to vector<16x128xf32>
    %111 = vector.extract_strided_slice %109 {offsets = [0, 1], sizes = [16, 128], strides = [1, 1]} : vector<16x132xf32> to vector<16x128xf32>
    %112 = vector.extract_strided_slice %109 {offsets = [0, 2], sizes = [16, 128], strides = [1, 1]} : vector<16x132xf32> to vector<16x128xf32>
    %113 = vector.extract_strided_slice %109 {offsets = [0, 3], sizes = [16, 128], strides = [1, 1]} : vector<16x132xf32> to vector<16x128xf32>
    %114 = vector.extract_strided_slice %109 {offsets = [0, 4], sizes = [16, 128], strides = [1, 1]} : vector<16x132xf32> to vector<16x128xf32>
    %115 = tpu.concatenate %110, %111, %112, %113, %114 in 0 : vector<16x128xf32>, vector<16x128xf32>, vector<16x128xf32>, vector<16x128xf32>, vector<16x128xf32> -> vector<80x128xf32>
    %c0_44 = arith.constant 0 : index
    %c0_45 = arith.constant 0 : index
    %116 = vector.load %arg18[%c0_44, %c0_45] : memref<8x80xf32, #tpu.memory_space<vmem>>, vector<8x80xf32>
    %cst_46 = arith.constant dense<0.000000e+00> : vector<8x128xf32>
    %117 = tpu.matmul %116, %115, %cst_46 {dimension_numbers = #tpu.dot_dimension_numbers<[1], [0], [0], [1], [0, 0, 1, 1], [], []>} : vector<8x80xf32>, vector<80x128xf32>, vector<8x128xf32> -> vector<8x128xf32>
    %c0_47 = arith.constant 0 : index
    %c0_48 = arith.constant 0 : index
    %118 = vector.load %arg19[%c0_47, %c0_48] : memref<8x1xf32, #tpu.memory_space<vmem>>, vector<8x1xf32>
    %119 = vector.broadcast %118 : vector<8x1xf32> to vector<8x128xf32>
    %120 = arith.addf %117, %119 : vector<8x128xf32>
    %121 = vector.broadcast %5 : vector<1x128xf32> to vector<8x128xf32>
    %122 = arith.mulf %120, %121 : vector<8x128xf32>
    %c0_49 = arith.constant 0 : index
    %c0_50 = arith.constant 0 : index
    %c0_51 = arith.constant 0 : index
    %123 = vector.load %arg8[%c0_49, %c0_50, %c0_51] : memref<1x8x1xf32, #tpu.memory_space<vmem>>, vector<1x8x1xf32>
    %124 = vector.shape_cast %123 : vector<1x8x1xf32> to vector<8x1xf32>
    %125 = vector.broadcast %6 : vector<1x128xf32> to vector<8x128xf32>
    %126 = vector.broadcast %124 : vector<8x1xf32> to vector<8x128xf32>
    %127 = arith.subf %125, %126 : vector<8x128xf32>
    %128 = arith.mulf %127, %127 : vector<8x128xf32>
    %cst_52 = arith.constant 0.000000e+00 : f32
    %129 = vector.broadcast %cst_52 : f32 to vector<8x1xf32>
    %cst_53 = arith.constant 0.000000e+00 : f32
    %130 = vector.broadcast %cst_53 : f32 to vector<8x1xf32>
    %131 = vector.extract_strided_slice %122 {offsets = [0, 0], sizes = [1, 128], strides = [1, 1]} : vector<8x128xf32> to vector<1x128xf32>
    %cst_54 = arith.constant -5.000000e-01 : f32
    %132 = vector.broadcast %cst_54 : f32 to vector<8x128xf32>
    %133 = arith.mulf %132, %128 : vector<8x128xf32>
    %c0_55 = arith.constant 0 : index
    %134 = memref.load %arg3[%c0_55] : memref<16xf32, #tpu.memory_space<smem>>
    %135 = vector.broadcast %134 : f32 to vector<8x128xf32>
    %136 = arith.mulf %133, %135 : vector<8x128xf32>
    %137 = math.exp %136 : vector<8x128xf32>
    %cst_56 = arith.constant -5.000000e-01 : f32
    %138 = vector.broadcast %cst_56 : f32 to vector<8x128xf32>
    %139 = arith.mulf %138, %128 : vector<8x128xf32>
    %c8 = arith.constant 8 : index
    %140 = memref.load %arg3[%c8] : memref<16xf32, #tpu.memory_space<smem>>
    %141 = vector.broadcast %140 : f32 to vector<8x128xf32>
    %142 = arith.mulf %139, %141 : vector<8x128xf32>
    %143 = math.exp %142 : vector<8x128xf32>
    %c0_57 = arith.constant 0 : index
    %144 = memref.load %arg4[%c0_57] : memref<16xf32, #tpu.memory_space<smem>>
    %145 = vector.broadcast %131 : vector<1x128xf32> to vector<8x128xf32>
    %146 = arith.mulf %137, %145 : vector<8x128xf32>
    %cst_58 = arith.constant dense<0.000000e+00> : vector<8xf32>
    %147 = vector.multi_reduction <add>, %146, %cst_58 [1] : vector<8x128xf32> to vector<8xf32>
    %148 = vector.shape_cast %147 : vector<8xf32> to vector<8x1xf32>
    %149 = vector.broadcast %144 : f32 to vector<8x1xf32>
    %150 = arith.mulf %149, %148 : vector<8x1xf32>
    %151 = arith.addf %129, %150 : vector<8x1xf32>
    %c8_59 = arith.constant 8 : index
    %152 = memref.load %arg4[%c8_59] : memref<16xf32, #tpu.memory_space<smem>>
    %153 = vector.broadcast %131 : vector<1x128xf32> to vector<8x128xf32>
    %154 = arith.mulf %143, %153 : vector<8x128xf32>
    %cst_60 = arith.constant dense<0.000000e+00> : vector<8xf32>
    %155 = vector.multi_reduction <add>, %154, %cst_60 [1] : vector<8x128xf32> to vector<8xf32>
    %156 = vector.shape_cast %155 : vector<8xf32> to vector<8x1xf32>
    %157 = vector.broadcast %152 : f32 to vector<8x1xf32>
    %158 = arith.mulf %157, %156 : vector<8x1xf32>
    %159 = arith.addf %130, %158 : vector<8x1xf32>
    %160 = vector.extract_strided_slice %122 {offsets = [1, 0], sizes = [1, 128], strides = [1, 1]} : vector<8x128xf32> to vector<1x128xf32>
    %cst_61 = arith.constant -5.000000e-01 : f32
    %161 = vector.broadcast %cst_61 : f32 to vector<8x128xf32>
    %162 = arith.mulf %161, %128 : vector<8x128xf32>
    %c1_62 = arith.constant 1 : index
    %163 = memref.load %arg3[%c1_62] : memref<16xf32, #tpu.memory_space<smem>>
    %164 = vector.broadcast %163 : f32 to vector<8x128xf32>
    %165 = arith.mulf %162, %164 : vector<8x128xf32>
    %166 = math.exp %165 : vector<8x128xf32>
    %cst_63 = arith.constant -5.000000e-01 : f32
    %167 = vector.broadcast %cst_63 : f32 to vector<8x128xf32>
    %168 = arith.mulf %167, %128 : vector<8x128xf32>
    %c9 = arith.constant 9 : index
    %169 = memref.load %arg3[%c9] : memref<16xf32, #tpu.memory_space<smem>>
    %170 = vector.broadcast %169 : f32 to vector<8x128xf32>
    %171 = arith.mulf %168, %170 : vector<8x128xf32>
    %172 = math.exp %171 : vector<8x128xf32>
    %c1_64 = arith.constant 1 : index
    %173 = memref.load %arg4[%c1_64] : memref<16xf32, #tpu.memory_space<smem>>
    %174 = vector.broadcast %160 : vector<1x128xf32> to vector<8x128xf32>
    %175 = arith.mulf %166, %174 : vector<8x128xf32>
    %cst_65 = arith.constant dense<0.000000e+00> : vector<8xf32>
    %176 = vector.multi_reduction <add>, %175, %cst_65 [1] : vector<8x128xf32> to vector<8xf32>
    %177 = vector.shape_cast %176 : vector<8xf32> to vector<8x1xf32>
    %178 = vector.broadcast %173 : f32 to vector<8x1xf32>
    %179 = arith.mulf %178, %177 : vector<8x1xf32>
    %180 = arith.addf %151, %179 : vector<8x1xf32>
    %c9_66 = arith.constant 9 : index
    %181 = memref.load %arg4[%c9_66] : memref<16xf32, #tpu.memory_space<smem>>
    %182 = vector.broadcast %160 : vector<1x128xf32> to vector<8x128xf32>
    %183 = arith.mulf %172, %182 : vector<8x128xf32>
    %cst_67 = arith.constant dense<0.000000e+00> : vector<8xf32>
    %184 = vector.multi_reduction <add>, %183, %cst_67 [1] : vector<8x128xf32> to vector<8xf32>
    %185 = vector.shape_cast %184 : vector<8xf32> to vector<8x1xf32>
    %186 = vector.broadcast %181 : f32 to vector<8x1xf32>
    %187 = arith.mulf %186, %185 : vector<8x1xf32>
    %188 = arith.addf %159, %187 : vector<8x1xf32>
    %189 = vector.extract_strided_slice %122 {offsets = [2, 0], sizes = [1, 128], strides = [1, 1]} : vector<8x128xf32> to vector<1x128xf32>
    %cst_68 = arith.constant -5.000000e-01 : f32
    %190 = vector.broadcast %cst_68 : f32 to vector<8x128xf32>
    %191 = arith.mulf %190, %128 : vector<8x128xf32>
    %c2 = arith.constant 2 : index
    %192 = memref.load %arg3[%c2] : memref<16xf32, #tpu.memory_space<smem>>
    %193 = vector.broadcast %192 : f32 to vector<8x128xf32>
    %194 = arith.mulf %191, %193 : vector<8x128xf32>
    %195 = math.exp %194 : vector<8x128xf32>
    %cst_69 = arith.constant -5.000000e-01 : f32
    %196 = vector.broadcast %cst_69 : f32 to vector<8x128xf32>
    %197 = arith.mulf %196, %128 : vector<8x128xf32>
    %c10 = arith.constant 10 : index
    %198 = memref.load %arg3[%c10] : memref<16xf32, #tpu.memory_space<smem>>
    %199 = vector.broadcast %198 : f32 to vector<8x128xf32>
    %200 = arith.mulf %197, %199 : vector<8x128xf32>
    %201 = math.exp %200 : vector<8x128xf32>
    %c2_70 = arith.constant 2 : index
    %202 = memref.load %arg4[%c2_70] : memref<16xf32, #tpu.memory_space<smem>>
    %203 = vector.broadcast %189 : vector<1x128xf32> to vector<8x128xf32>
    %204 = arith.mulf %195, %203 : vector<8x128xf32>
    %cst_71 = arith.constant dense<0.000000e+00> : vector<8xf32>
    %205 = vector.multi_reduction <add>, %204, %cst_71 [1] : vector<8x128xf32> to vector<8xf32>
    %206 = vector.shape_cast %205 : vector<8xf32> to vector<8x1xf32>
    %207 = vector.broadcast %202 : f32 to vector<8x1xf32>
    %208 = arith.mulf %207, %206 : vector<8x1xf32>
    %209 = arith.addf %180, %208 : vector<8x1xf32>
    %c10_72 = arith.constant 10 : index
    %210 = memref.load %arg4[%c10_72] : memref<16xf32, #tpu.memory_space<smem>>
    %211 = vector.broadcast %189 : vector<1x128xf32> to vector<8x128xf32>
    %212 = arith.mulf %201, %211 : vector<8x128xf32>
    %cst_73 = arith.constant dense<0.000000e+00> : vector<8xf32>
    %213 = vector.multi_reduction <add>, %212, %cst_73 [1] : vector<8x128xf32> to vector<8xf32>
    %214 = vector.shape_cast %213 : vector<8xf32> to vector<8x1xf32>
    %215 = vector.broadcast %210 : f32 to vector<8x1xf32>
    %216 = arith.mulf %215, %214 : vector<8x1xf32>
    %217 = arith.addf %188, %216 : vector<8x1xf32>
    %218 = vector.extract_strided_slice %122 {offsets = [3, 0], sizes = [1, 128], strides = [1, 1]} : vector<8x128xf32> to vector<1x128xf32>
    %cst_74 = arith.constant -5.000000e-01 : f32
    %219 = vector.broadcast %cst_74 : f32 to vector<8x128xf32>
    %220 = arith.mulf %219, %128 : vector<8x128xf32>
    %c3 = arith.constant 3 : index
    %221 = memref.load %arg3[%c3] : memref<16xf32, #tpu.memory_space<smem>>
    %222 = vector.broadcast %221 : f32 to vector<8x128xf32>
    %223 = arith.mulf %220, %222 : vector<8x128xf32>
    %224 = math.exp %223 : vector<8x128xf32>
    %cst_75 = arith.constant -5.000000e-01 : f32
    %225 = vector.broadcast %cst_75 : f32 to vector<8x128xf32>
    %226 = arith.mulf %225, %128 : vector<8x128xf32>
    %c11 = arith.constant 11 : index
    %227 = memref.load %arg3[%c11] : memref<16xf32, #tpu.memory_space<smem>>
    %228 = vector.broadcast %227 : f32 to vector<8x128xf32>
    %229 = arith.mulf %226, %228 : vector<8x128xf32>
    %230 = math.exp %229 : vector<8x128xf32>
    %c3_76 = arith.constant 3 : index
    %231 = memref.load %arg4[%c3_76] : memref<16xf32, #tpu.memory_space<smem>>
    %232 = vector.broadcast %218 : vector<1x128xf32> to vector<8x128xf32>
    %233 = arith.mulf %224, %232 : vector<8x128xf32>
    %cst_77 = arith.constant dense<0.000000e+00> : vector<8xf32>
    %234 = vector.multi_reduction <add>, %233, %cst_77 [1] : vector<8x128xf32> to vector<8xf32>
    %235 = vector.shape_cast %234 : vector<8xf32> to vector<8x1xf32>
    %236 = vector.broadcast %231 : f32 to vector<8x1xf32>
    %237 = arith.mulf %236, %235 : vector<8x1xf32>
    %238 = arith.addf %209, %237 : vector<8x1xf32>
    %c11_78 = arith.constant 11 : index
    %239 = memref.load %arg4[%c11_78] : memref<16xf32, #tpu.memory_space<smem>>
    %240 = vector.broadcast %218 : vector<1x128xf32> to vector<8x128xf32>
    %241 = arith.mulf %230, %240 : vector<8x128xf32>
    %cst_79 = arith.constant dense<0.000000e+00> : vector<8xf32>
    %242 = vector.multi_reduction <add>, %241, %cst_79 [1] : vector<8x128xf32> to vector<8xf32>
    %243 = vector.shape_cast %242 : vector<8xf32> to vector<8x1xf32>
    %244 = vector.broadcast %239 : f32 to vector<8x1xf32>
    %245 = arith.mulf %244, %243 : vector<8x1xf32>
    %246 = arith.addf %217, %245 : vector<8x1xf32>
    %247 = vector.extract_strided_slice %122 {offsets = [4, 0], sizes = [1, 128], strides = [1, 1]} : vector<8x128xf32> to vector<1x128xf32>
    %cst_80 = arith.constant -5.000000e-01 : f32
    %248 = vector.broadcast %cst_80 : f32 to vector<8x128xf32>
    %249 = arith.mulf %248, %128 : vector<8x128xf32>
    %c4 = arith.constant 4 : index
    %250 = memref.load %arg3[%c4] : memref<16xf32, #tpu.memory_space<smem>>
    %251 = vector.broadcast %250 : f32 to vector<8x128xf32>
    %252 = arith.mulf %249, %251 : vector<8x128xf32>
    %253 = math.exp %252 : vector<8x128xf32>
    %cst_81 = arith.constant -5.000000e-01 : f32
    %254 = vector.broadcast %cst_81 : f32 to vector<8x128xf32>
    %255 = arith.mulf %254, %128 : vector<8x128xf32>
    %c12 = arith.constant 12 : index
    %256 = memref.load %arg3[%c12] : memref<16xf32, #tpu.memory_space<smem>>
    %257 = vector.broadcast %256 : f32 to vector<8x128xf32>
    %258 = arith.mulf %255, %257 : vector<8x128xf32>
    %259 = math.exp %258 : vector<8x128xf32>
    %c4_82 = arith.constant 4 : index
    %260 = memref.load %arg4[%c4_82] : memref<16xf32, #tpu.memory_space<smem>>
    %261 = vector.broadcast %247 : vector<1x128xf32> to vector<8x128xf32>
    %262 = arith.mulf %253, %261 : vector<8x128xf32>
    %cst_83 = arith.constant dense<0.000000e+00> : vector<8xf32>
    %263 = vector.multi_reduction <add>, %262, %cst_83 [1] : vector<8x128xf32> to vector<8xf32>
    %264 = vector.shape_cast %263 : vector<8xf32> to vector<8x1xf32>
    %265 = vector.broadcast %260 : f32 to vector<8x1xf32>
    %266 = arith.mulf %265, %264 : vector<8x1xf32>
    %267 = arith.addf %238, %266 : vector<8x1xf32>
    %c12_84 = arith.constant 12 : index
    %268 = memref.load %arg4[%c12_84] : memref<16xf32, #tpu.memory_space<smem>>
    %269 = vector.broadcast %247 : vector<1x128xf32> to vector<8x128xf32>
    %270 = arith.mulf %259, %269 : vector<8x128xf32>
    %cst_85 = arith.constant dense<0.000000e+00> : vector<8xf32>
    %271 = vector.multi_reduction <add>, %270, %cst_85 [1] : vector<8x128xf32> to vector<8xf32>
    %272 = vector.shape_cast %271 : vector<8xf32> to vector<8x1xf32>
    %273 = vector.broadcast %268 : f32 to vector<8x1xf32>
    %274 = arith.mulf %273, %272 : vector<8x1xf32>
    %275 = arith.addf %246, %274 : vector<8x1xf32>
    %276 = vector.extract_strided_slice %122 {offsets = [5, 0], sizes = [1, 128], strides = [1, 1]} : vector<8x128xf32> to vector<1x128xf32>
    %cst_86 = arith.constant -5.000000e-01 : f32
    %277 = vector.broadcast %cst_86 : f32 to vector<8x128xf32>
    %278 = arith.mulf %277, %128 : vector<8x128xf32>
    %c5 = arith.constant 5 : index
    %279 = memref.load %arg3[%c5] : memref<16xf32, #tpu.memory_space<smem>>
    %280 = vector.broadcast %279 : f32 to vector<8x128xf32>
    %281 = arith.mulf %278, %280 : vector<8x128xf32>
    %282 = math.exp %281 : vector<8x128xf32>
    %cst_87 = arith.constant -5.000000e-01 : f32
    %283 = vector.broadcast %cst_87 : f32 to vector<8x128xf32>
    %284 = arith.mulf %283, %128 : vector<8x128xf32>
    %c13 = arith.constant 13 : index
    %285 = memref.load %arg3[%c13] : memref<16xf32, #tpu.memory_space<smem>>
    %286 = vector.broadcast %285 : f32 to vector<8x128xf32>
    %287 = arith.mulf %284, %286 : vector<8x128xf32>
    %288 = math.exp %287 : vector<8x128xf32>
    %c5_88 = arith.constant 5 : index
    %289 = memref.load %arg4[%c5_88] : memref<16xf32, #tpu.memory_space<smem>>
    %290 = vector.broadcast %276 : vector<1x128xf32> to vector<8x128xf32>
    %291 = arith.mulf %282, %290 : vector<8x128xf32>
    %cst_89 = arith.constant dense<0.000000e+00> : vector<8xf32>
    %292 = vector.multi_reduction <add>, %291, %cst_89 [1] : vector<8x128xf32> to vector<8xf32>
    %293 = vector.shape_cast %292 : vector<8xf32> to vector<8x1xf32>
    %294 = vector.broadcast %289 : f32 to vector<8x1xf32>
    %295 = arith.mulf %294, %293 : vector<8x1xf32>
    %296 = arith.addf %267, %295 : vector<8x1xf32>
    %c13_90 = arith.constant 13 : index
    %297 = memref.load %arg4[%c13_90] : memref<16xf32, #tpu.memory_space<smem>>
    %298 = vector.broadcast %276 : vector<1x128xf32> to vector<8x128xf32>
    %299 = arith.mulf %288, %298 : vector<8x128xf32>
    %cst_91 = arith.constant dense<0.000000e+00> : vector<8xf32>
    %300 = vector.multi_reduction <add>, %299, %cst_91 [1] : vector<8x128xf32> to vector<8xf32>
    %301 = vector.shape_cast %300 : vector<8xf32> to vector<8x1xf32>
    %302 = vector.broadcast %297 : f32 to vector<8x1xf32>
    %303 = arith.mulf %302, %301 : vector<8x1xf32>
    %304 = arith.addf %275, %303 : vector<8x1xf32>
    %305 = vector.extract_strided_slice %122 {offsets = [6, 0], sizes = [1, 128], strides = [1, 1]} : vector<8x128xf32> to vector<1x128xf32>
    %cst_92 = arith.constant -5.000000e-01 : f32
    %306 = vector.broadcast %cst_92 : f32 to vector<8x128xf32>
    %307 = arith.mulf %306, %128 : vector<8x128xf32>
    %c6 = arith.constant 6 : index
    %308 = memref.load %arg3[%c6] : memref<16xf32, #tpu.memory_space<smem>>
    %309 = vector.broadcast %308 : f32 to vector<8x128xf32>
    %310 = arith.mulf %307, %309 : vector<8x128xf32>
    %311 = math.exp %310 : vector<8x128xf32>
    %cst_93 = arith.constant -5.000000e-01 : f32
    %312 = vector.broadcast %cst_93 : f32 to vector<8x128xf32>
    %313 = arith.mulf %312, %128 : vector<8x128xf32>
    %c14 = arith.constant 14 : index
    %314 = memref.load %arg3[%c14] : memref<16xf32, #tpu.memory_space<smem>>
    %315 = vector.broadcast %314 : f32 to vector<8x128xf32>
    %316 = arith.mulf %313, %315 : vector<8x128xf32>
    %317 = math.exp %316 : vector<8x128xf32>
    %c6_94 = arith.constant 6 : index
    %318 = memref.load %arg4[%c6_94] : memref<16xf32, #tpu.memory_space<smem>>
    %319 = vector.broadcast %305 : vector<1x128xf32> to vector<8x128xf32>
    %320 = arith.mulf %311, %319 : vector<8x128xf32>
    %cst_95 = arith.constant dense<0.000000e+00> : vector<8xf32>
    %321 = vector.multi_reduction <add>, %320, %cst_95 [1] : vector<8x128xf32> to vector<8xf32>
    %322 = vector.shape_cast %321 : vector<8xf32> to vector<8x1xf32>
    %323 = vector.broadcast %318 : f32 to vector<8x1xf32>
    %324 = arith.mulf %323, %322 : vector<8x1xf32>
    %325 = arith.addf %296, %324 : vector<8x1xf32>
    %c14_96 = arith.constant 14 : index
    %326 = memref.load %arg4[%c14_96] : memref<16xf32, #tpu.memory_space<smem>>
    %327 = vector.broadcast %305 : vector<1x128xf32> to vector<8x128xf32>
    %328 = arith.mulf %317, %327 : vector<8x128xf32>
    %cst_97 = arith.constant dense<0.000000e+00> : vector<8xf32>
    %329 = vector.multi_reduction <add>, %328, %cst_97 [1] : vector<8x128xf32> to vector<8xf32>
    %330 = vector.shape_cast %329 : vector<8xf32> to vector<8x1xf32>
    %331 = vector.broadcast %326 : f32 to vector<8x1xf32>
    %332 = arith.mulf %331, %330 : vector<8x1xf32>
    %333 = arith.addf %304, %332 : vector<8x1xf32>
    %334 = vector.extract_strided_slice %122 {offsets = [7, 0], sizes = [1, 128], strides = [1, 1]} : vector<8x128xf32> to vector<1x128xf32>
    %cst_98 = arith.constant -5.000000e-01 : f32
    %335 = vector.broadcast %cst_98 : f32 to vector<8x128xf32>
    %336 = arith.mulf %335, %128 : vector<8x128xf32>
    %c7 = arith.constant 7 : index
    %337 = memref.load %arg3[%c7] : memref<16xf32, #tpu.memory_space<smem>>
    %338 = vector.broadcast %337 : f32 to vector<8x128xf32>
    %339 = arith.mulf %336, %338 : vector<8x128xf32>
    %340 = math.exp %339 : vector<8x128xf32>
    %cst_99 = arith.constant -5.000000e-01 : f32
    %341 = vector.broadcast %cst_99 : f32 to vector<8x128xf32>
    %342 = arith.mulf %341, %128 : vector<8x128xf32>
    %c15 = arith.constant 15 : index
    %343 = memref.load %arg3[%c15] : memref<16xf32, #tpu.memory_space<smem>>
    %344 = vector.broadcast %343 : f32 to vector<8x128xf32>
    %345 = arith.mulf %342, %344 : vector<8x128xf32>
    %346 = math.exp %345 : vector<8x128xf32>
    %c7_100 = arith.constant 7 : index
    %347 = memref.load %arg4[%c7_100] : memref<16xf32, #tpu.memory_space<smem>>
    %348 = vector.broadcast %334 : vector<1x128xf32> to vector<8x128xf32>
    %349 = arith.mulf %340, %348 : vector<8x128xf32>
    %cst_101 = arith.constant dense<0.000000e+00> : vector<8xf32>
    %350 = vector.multi_reduction <add>, %349, %cst_101 [1] : vector<8x128xf32> to vector<8xf32>
    %351 = vector.shape_cast %350 : vector<8xf32> to vector<8x1xf32>
    %352 = vector.broadcast %347 : f32 to vector<8x1xf32>
    %353 = arith.mulf %352, %351 : vector<8x1xf32>
    %354 = arith.addf %325, %353 : vector<8x1xf32>
    %c15_102 = arith.constant 15 : index
    %355 = memref.load %arg4[%c15_102] : memref<16xf32, #tpu.memory_space<smem>>
    %356 = vector.broadcast %334 : vector<1x128xf32> to vector<8x128xf32>
    %357 = arith.mulf %346, %356 : vector<8x128xf32>
    %cst_103 = arith.constant dense<0.000000e+00> : vector<8xf32>
    %358 = vector.multi_reduction <add>, %357, %cst_103 [1] : vector<8x128xf32> to vector<8xf32>
    %359 = vector.shape_cast %358 : vector<8xf32> to vector<8x1xf32>
    %360 = vector.broadcast %355 : f32 to vector<8x1xf32>
    %361 = arith.mulf %360, %359 : vector<8x1xf32>
    %362 = arith.addf %333, %361 : vector<8x1xf32>
    %c0_104 = arith.constant 0 : index
    %363 = memref.load %arg5[%c0_104] : memref<2xf32, #tpu.memory_space<smem>>
    %364 = vector.broadcast %363 : f32 to vector<8x1xf32>
    %365 = arith.addf %354, %364 : vector<8x1xf32>
    %c1_105 = arith.constant 1 : index
    %366 = memref.load %arg5[%c1_105] : memref<2xf32, #tpu.memory_space<smem>>
    %367 = vector.broadcast %366 : f32 to vector<8x1xf32>
    %368 = arith.addf %362, %367 : vector<8x1xf32>
    %cst_106 = arith.constant 2.000000e+01 : f32
    %369 = vector.broadcast %cst_106 : f32 to vector<8x1xf32>
    %370 = arith.cmpf ogt, %368, %369 : vector<8x1xf32>
    %cst_107 = arith.constant 2.000000e+01 : f32
    %371 = vector.broadcast %cst_107 : f32 to vector<8x1xf32>
    %372 = arith.minimumf %368, %371 : vector<8x1xf32>
    %373 = math.exp %372 : vector<8x1xf32>
    %cst_108 = arith.constant 1.000000e+00 : f32
    %374 = vector.broadcast %cst_108 : f32 to vector<8x1xf32>
    %375 = arith.addf %374, %373 : vector<8x1xf32>
    %376 = math.log %375 : vector<8x1xf32>
    %377 = arith.select %370, %368, %376 : vector<8x1xi1>, vector<8x1xf32>
    %c0_109 = arith.constant 0 : index
    %c0_110 = arith.constant 0 : index
    %c0_111 = arith.constant 0 : index
    %378 = vector.load %arg20[%c0_109, %c0_110, %c0_111] : memref<1x8x1xf32, #tpu.memory_space<vmem>>, vector<1x8x1xf32>
    %379 = vector.shape_cast %378 : vector<1x8x1xf32> to vector<8x1xf32>
    %380 = vector.shape_cast %365 : vector<8x1xf32> to vector<1x8x1xf32>
    tpu.vector_store %arg20[%c0_109, %c0_110, %c0_111], %380 {strides = array<i32>} : memref<1x8x1xf32, #tpu.memory_space<vmem>>, vector<1x8x1xf32>,
    %c0_112 = arith.constant 0 : index
    %c0_113 = arith.constant 0 : index
    %c0_114 = arith.constant 0 : index
    %381 = vector.load %arg21[%c0_112, %c0_113, %c0_114] : memref<1x8x1xf32, #tpu.memory_space<vmem>>, vector<1x8x1xf32>
    %382 = vector.shape_cast %381 : vector<1x8x1xf32> to vector<8x1xf32>
    %383 = vector.shape_cast %377 : vector<8x1xf32> to vector<1x8x1xf32>
    tpu.vector_store %arg21[%c0_112, %c0_113, %c0_114], %383 {strides = array<i32>} : memref<1x8x1xf32, #tpu.memory_space<vmem>>, vector<1x8x1xf32>,
    return
  }
  func.func @transform_0(%arg0: i32) -> i32 {
    %c0_i32 = arith.constant 0 : i32
    %c0_i32_0 = arith.constant 0 : i32
    return %c0_i32 : i32
  }
  func.func @transform_1(%arg0: i32) -> i32 {
    %c0_i32 = arith.constant 0 : i32
    %c0_i32_0 = arith.constant 0 : i32
    return %c0_i32 : i32
  }
  func.func @transform_2(%arg0: i32) -> i32 {
    %c0_i32 = arith.constant 0 : i32
    %c0_i32_0 = arith.constant 0 : i32
    return %c0_i32 : i32
  }
  func.func @transform_3(%arg0: i32) -> i32 {
    %c0_i32 = arith.constant 0 : i32
    %c0_i32_0 = arith.constant 0 : i32
    return %c0_i32 : i32
  }
  func.func @transform_4(%arg0: i32) -> i32 {
    %c0_i32 = arith.constant 0 : i32
    %c0_i32_0 = arith.constant 0 : i32
    return %c0_i32 : i32
  }
  func.func @transform_5(%arg0: i32) -> (i32, i32, i32) {
    %c0_i32 = arith.constant 0 : i32
    %c0_i32_0 = arith.constant 0 : i32
    %c0_i32_1 = arith.constant 0 : i32
    return %arg0, %c0_i32, %c0_i32_0 : i32, i32, i32
  }
  func.func @transform_6(%arg0: i32) -> (i32, i32, i32) {
    %c0_i32 = arith.constant 0 : i32
    %c0_i32_0 = arith.constant 0 : i32
    %c0_i32_1 = arith.constant 0 : i32
    return %arg0, %c0_i32, %c0_i32_0 : i32, i32, i32
  }
  func.func @transform_7(%arg0: i32) -> (i32, i32, i32) {
    %c0_i32 = arith.constant 0 : i32
    %c0_i32_0 = arith.constant 0 : i32
    %c0_i32_1 = arith.constant 0 : i32
    return %arg0, %c0_i32, %c0_i32_0 : i32, i32, i32
  }
  func.func @transform_8(%arg0: i32) -> (i32, i32) {
    %c0_i32 = arith.constant 0 : i32
    %c0_i32_0 = arith.constant 0 : i32
    %c0_i32_1 = arith.constant 0 : i32
    return %c0_i32, %c0_i32_0 : i32, i32
  }
  func.func @transform_9(%arg0: i32) -> (i32, i32) {
    %c0_i32 = arith.constant 0 : i32
    %c0_i32_0 = arith.constant 0 : i32
    %c0_i32_1 = arith.constant 0 : i32
    return %c0_i32, %c0_i32_0 : i32, i32
  }
  func.func @transform_10(%arg0: i32) -> (i32, i32) {
    %c0_i32 = arith.constant 0 : i32
    %c0_i32_0 = arith.constant 0 : i32
    %c0_i32_1 = arith.constant 0 : i32
    return %c0_i32, %c0_i32_0 : i32, i32
  }
  func.func @transform_11(%arg0: i32) -> (i32, i32) {
    %c0_i32 = arith.constant 0 : i32
    %c0_i32_0 = arith.constant 0 : i32
    %c0_i32_1 = arith.constant 0 : i32
    return %c0_i32, %c0_i32_0 : i32, i32
  }
  func.func @transform_12(%arg0: i32) -> (i32, i32) {
    %c0_i32 = arith.constant 0 : i32
    %c0_i32_0 = arith.constant 0 : i32
    %c0_i32_1 = arith.constant 0 : i32
    return %c0_i32, %c0_i32_0 : i32, i32
  }
  func.func @transform_13(%arg0: i32) -> (i32, i32) {
    %c0_i32 = arith.constant 0 : i32
    %c0_i32_0 = arith.constant 0 : i32
    %c0_i32_1 = arith.constant 0 : i32
    return %c0_i32, %c0_i32_0 : i32, i32
  }
  func.func @transform_14(%arg0: i32) -> (i32, i32) {
    %c0_i32 = arith.constant 0 : i32
    %c0_i32_0 = arith.constant 0 : i32
    %c0_i32_1 = arith.constant 0 : i32
    return %c0_i32, %c0_i32_0 : i32, i32
  }
  func.func @transform_15(%arg0: i32) -> (i32, i32) {
    %c0_i32 = arith.constant 0 : i32
    %c0_i32_0 = arith.constant 0 : i32
    %c0_i32_1 = arith.constant 0 : i32
    return %c0_i32, %c0_i32_0 : i32, i32
  }
  func.func @transform_16(%arg0: i32) -> (i32, i32) {
    %c0_i32 = arith.constant 0 : i32
    %c0_i32_0 = arith.constant 0 : i32
    %c0_i32_1 = arith.constant 0 : i32
    return %c0_i32, %c0_i32_0 : i32, i32
  }
  func.func @transform_17(%arg0: i32) -> (i32, i32) {
    %c0_i32 = arith.constant 0 : i32
    %c0_i32_0 = arith.constant 0 : i32
    %c0_i32_1 = arith.constant 0 : i32
    return %c0_i32, %c0_i32_0 : i32, i32
  }
  func.func @transform_18(%arg0: i32) -> (i32, i32) {
    %c0_i32 = arith.constant 0 : i32
    %c0_i32_0 = arith.constant 0 : i32
    %c0_i32_1 = arith.constant 0 : i32
    return %c0_i32, %c0_i32_0 : i32, i32
  }
  func.func @transform_19(%arg0: i32) -> (i32, i32, i32) {
    %c0_i32 = arith.constant 0 : i32
    %c0_i32_0 = arith.constant 0 : i32
    %c0_i32_1 = arith.constant 0 : i32
    return %arg0, %c0_i32, %c0_i32_0 : i32, i32, i32
  }
  func.func @transform_20(%arg0: i32) -> (i32, i32, i32) {
    %c0_i32 = arith.constant 0 : i32
    %c0_i32_0 = arith.constant 0 : i32
    %c0_i32_1 = arith.constant 0 : i32
    return %arg0, %c0_i32, %c0_i32_0 : i32, i32, i32
  }
}

</mosaic_0001>

<bundles_post_ra>
// kernel: tpu_custom_call.1
= control target key start
LH: loop header
LB: loop body
LE: loop exit
PB: predicated region body
PF: predicated region fallthrough
CT: control target
= control target key end

     0   :  { %s3098_s0 = inlined_call_operand.<no memory space> [shape: s32[1], index: 0, kind: input, shape index: {}]   ;;  %s3099_s1 = inlined_call_operand.vmem [shape: f32[2], index: 1, kind: input, shape index: {}]   ;;  %s3100_s2 = inlined_call_operand.vmem [shape: f32[16], index: 2, kind: input, shape index: {}]   ;;  %s3101_s3 = inlined_call_operand.vmem [shape: f32[16], index: 3, kind: input, shape index: {}]   ;;  %s3102_s4 = inlined_call_operand.vmem [shape: f32[2], index: 4, kind: input, shape index: {}]   ;;  %s3103_s5 = inlined_call_operand.vmem [shape: f32[2,8,1], index: 5, kind: input, shape index: {}]   ;;  %s3104_s6 = inlined_call_operand.vmem [shape: f32[2,8,1], index: 6, kind: input, shape index: {}]   ;;  %s3105_s7 = inlined_call_operand.vmem [shape: f32[2,8,1], index: 7, kind: input, shape index: {}]   ;;  %s3106_s8 = inlined_call_operand.vmem [shape: f32[1,128], index: 8, kind: input, shape index: {}]   ;;  %s3107_s9 = inlined_call_operand.vmem [shape: f32[8,2], index: 9, kind: input, shape index: {}]   ;;  %s3108_s10 = inlined_call_operand.vmem [shape: f32[8,1], index: 10, kind: input, shape index: {}]   ;;  %s3109_s11 = inlined_call_operand.vmem [shape: f32[16,40], index: 11, kind: input, shape index: {}]   ;;  %s3110_s12 = inlined_call_operand.vmem [shape: f32[16,1], index: 12, kind: input, shape index: {}]   ;;  %s3111_s13 = inlined_call_operand.vmem [shape: f32[32,80], index: 13, kind: input, shape index: {}]   ;;  %s3112_s14 = inlined_call_operand.vmem [shape: f32[32,1], index: 14, kind: input, shape index: {}]   ;;  %s3113_s15 = inlined_call_operand.vmem [shape: f32[16,160], index: 15, kind: input, shape index: {}]   ;;  %s3114_s16 = inlined_call_operand.vmem [shape: f32[16,1], index: 16, kind: input, shape index: {}]   ;;  %s3115_s17 = inlined_call_operand.vmem [shape: f32[8,80], index: 17, kind: input, shape index: {}]   ;;  %s3116_s18 = inlined_call_operand.vmem [shape: f32[8,1], index: 18, kind: input, shape index: {}]   ;;  %s3117_s19 = inlined_call_operand.vmem [shape: f32[2,8,1], index: 19, kind: output, shape index: {0}]   ;;  %s3118_s20 = inlined_call_operand.vmem [shape: f32[2,8,1], index: 20, kind: output, shape index: {1}]  }
   0x1   :  { %3119 = sst [smem:[#allocation13_spill]] %s3098_s0 }
   0x2   :  { %3120 = sst [smem:[#allocation14_spill]] %s3099_s1  ;;  %s3124_s23 = sld [smem:[#allocation13_spill]] }
   0x3   :  { %3121 = sst [smem:[#allocation15_spill]] %s3100_s2 }
   0x4   :  { %3122 = sst [smem:[#allocation16_spill]] %s3101_s3 }
   0x5   :  { %3123 = sst [smem:[#allocation17_spill]] %s3102_s4 }
   0x8   :  { %26 = sst [smem:[#allocation2]] %s3124_s23 }
   0x9   :  { %27 = vsyncpa [#allocation4], 0 }
   0xa   :  { %28 = vsyncpa [#allocation6], 0 }
   0xb   :  { %29 = vsyncpa [#allocation9], 0  ;;  %s2677_s24 = smov 0  }
   0xc LB: > { %s3125_s3 = sld [smem:[#allocation15_spill]]  ;;  %s2686_s27 = sadd.s32 4294967295, %s2552_s24   ;;  %s2552_s24 = sphi %s2677_s24, %s35_s24  }
   0xd   : > { %p1916_p0 = scmp.ge.s32.totalorder %s2552_s24, 1  ;;  %p506_p1 = scmp.lt.s32.totalorder %s2552_s24, 3 }
   0xe   : > { %p2198_p2 = scmp.eq.s32.totalorder %s2686_s27, 0  ;;  %s3127_s30 = sld [smem:[#allocation14_spill]] }
   0xf   : > { %p2691_p3 = pnand %p1916_p0, %p506_p1  ;;  %s3128_s22 = sld [smem:[#allocation16_spill]] }
  0x10   : > { %s3130_s4 = sld [smem:[#allocation17_spill]] }
  0x11   : > { %p2185_p4 = pneg %p2691_p3 }
  0x12   : > { %s533_s26 = sshll.u32 %s3125_s3, 4  ;;  %s534_s26 = int_to_ptr.vmem [resolvable:$true] %s533_s26 }
  0x13   : > { %p2709_p5 = pnand %p2198_p2, %p2185_p4  ;;  %p2482_p10 = scmp.lt.s32.totalorder %s534_s26, %s534_s26 }
  0x14   : > { %s522_s0 = sshll.u32 %s3127_s30, 4  ;;  %s2474_s30 = scalar_lea.vmem %s534_s26, 16  ;;  %s2698_s0 = int_to_ptr.vmem [resolvable:$true] %s522_s0 }
  0x15   : > { %s544_s23 = sshll.u32 %s3128_s22, 4  ;;  %p2475_p6 = scmp.ne.s32.totalorder %s534_s26, %s2474_s30  ;;  %s2705_s23 = int_to_ptr.vmem [resolvable:$true] %s544_s23 }
  0x16   : > { %s555_s29 = sshll.u32 %s3130_s4, 4  ;;  %p2476_p7 = pneg %p2709_p5  ;;  %s2716_s29 = int_to_ptr.vmem [resolvable:$true] %s555_s29 }
  0x17   : > { %p2483_p11 = scmp.lt.s32.totalorder %s2474_s30, %s2474_s30 }
  0x18   : > { %p2477_p8 = pnand %p2476_p7, %p2475_p6 }
  0x19   : > { %p2484_p12 = por %p2483_p11, %p2482_p10 }
  0x1a   : > { %p2478_p9 = pneg %p2477_p8 }
  0x1c   : > { %p2485_p13 = pnand %p2484_p12, %p2478_p9 }
  0x1e   : > { %2488 = shalt.err (!%p2485_p13)
}
  0x1f   : > { %s2554_s21 = smov [#allocation5]   ;;  %s2489_s1 = scalar_lea.vmem %s2698_s0, 16 }
  0x20   : > { %2191 = dma.vmem_to_smem (!%p2709_p5), %s534_s26, 16, %s2554_s21, [#allocation6]  }
  0x21   : > { %p2490_p0 = scmp.ne.s32.totalorder %s2698_s0, %s2489_s1  ;;  %p2497_p6 = scmp.lt.s32.totalorder %s2698_s0, %s2698_s0 }
  0x22   : > { %p2498_p8 = scmp.lt.s32.totalorder %s2489_s1, %s2489_s1 }
  0x23   : > { %p2492_p1 = pnand %p2490_p0, %p2476_p7 }
  0x24   : > { %p2499_p10 = por %p2498_p8, %p2497_p6 }
  0x25   : > { %p2493_p4 = pneg %p2492_p1 }
  0x27   : > { %p2500_p9 = pnand %p2499_p10, %p2493_p4 }
  0x29   : > { %2503 = shalt.err (!%p2500_p9)
}
  0x2a   : > { %s2555_s22 = smov [#allocation3]   ;;  %s2504_s26 = scalar_lea.vmem %s2705_s23, 16 }
  0x2b   : > { %2188 = dma.vmem_to_smem (!%p2709_p5), %s2698_s0, 16, %s2555_s22, [#allocation4]  }
  0x2c   : > { %p2505_p11 = scmp.ne.s32.totalorder %s2705_s23, %s2504_s26  ;;  %p2512_p0 = scmp.lt.s32.totalorder %s2705_s23, %s2705_s23 }
  0x2d   : > { %p2513_p1 = scmp.lt.s32.totalorder %s2504_s26, %s2504_s26 }
  0x2e   : > { %p2507_p12 = pnand %p2505_p11, %p2476_p7 }
  0x2f   : > { %p2514_p4 = por %p2513_p1, %p2512_p0 }
  0x30   : > { %p2508_p13 = pneg %p2507_p12 }
  0x32   : > { %p2515_p6 = pnand %p2514_p4, %p2508_p13 }
  0x34   : > { %2518 = shalt.err (!%p2515_p6)
}
  0x35   : > { %s2556_s25 = smov [#allocation7]   ;;  %s2519_s0 = scalar_lea.vmem %s2716_s29, 16 }
  0x36   : > { %2194 = dma.vmem_to_smem (!%p2709_p5), %s2705_s23, 16, %s2556_s25, [#allocation6]  }
  0x37   : > { %p2520_p8 = scmp.ne.s32.totalorder %s2716_s29, %s2519_s0  ;;  %p2527_p11 = scmp.lt.s32.totalorder %s2716_s29, %s2716_s29 }
  0x38   : > { %p2528_p12 = scmp.lt.s32.totalorder %s2519_s0, %s2519_s0 }
  0x39   : > { %p2522_p10 = pnand %p2520_p8, %p2476_p7 }
  0x3a   : > { %p2529_p13 = por %p2528_p12, %p2527_p11 }
  0x3b   : > { %p2523_p9 = pneg %p2522_p10 }
  0x3d   : > { %p2530_p0 = pnand %p2529_p13, %p2523_p9 }
  0x3f   : > { %2533 = shalt.err (!%p2530_p0)
}
  0x40   : > { %s2557_s3 = smov [#allocation8]   ;;  %622 = sbr.rel (%p2691_p3) target bundleno = 2409 (0x969), region = 96 }
  0x41   : > { %2197 = dma.vmem_to_smem (!%p2709_p5), %s2716_s29, 16, %s2557_s3, [#allocation9]  }
  0x47   : > { %2539 = dma.done.wait (%p2198_p2), [#allocation4], 16  }
  0x48   : > { %2541 = vsyncadd (%p2198_p2), [#allocation4], 4294967280 }
  0x49   : > { %2543 = dma.done.wait (%p2198_p2), [#allocation6], 32  }
  0x4a   : > { %2545 = vsyncadd (%p2198_p2), [#allocation6], 4294967264 }
  0x4b   : > { %2547 = dma.done.wait (%p2198_p2), [#allocation9], 16  }
  0x4c   : > { %2549 = vsyncadd (%p2198_p2), [#allocation9], 4294967280 }
  0x4d   : > { %640 = sfence }
  0x4e   : > { %p703_p3 = scmp.lt.s32.totalorder %s2686_s27, 1  ;;  %v778_v0 = vld [vmem:[%s3107_s9] sm:$0xff]  ;;  %v2558_v1 = vmov 0   ;;  %v2559_v3 = vmov 1   ;;  %s747_s25 = sld [smem:[#allocation3]]  ;;  %v724_v46 = vlaneseq  ;;  %v2560_v50 = vmov 0.0  }
  0x4f   : > { %2229 = vset.pattern.permute.xlu0 %v2558_v1  ;;  %2230 = vset.pattern.permute.xlu1 %v2558_v1  ;;  %v791_v5 = vld [vmem:[%s3108_s10] sm:$0xff]  ;;  %s1934_s0 = sld [smem:[#allocation3 + $0x1]]  ;;  %s723_s23 = sld [smem:[#allocation2]]  ;;  %vm809_vm1 = vcmask 15360   ;;  %vm856_vm2 = vcmask 326656   ;;  %v845_v59 = vld [vmem:[%s3110_s12 + $0x8] sm:$0xff] }
  0x50   : > { %s3136_s27 = smov (!%p703_p3, %s2686_s27), 1  ;;  %781 = vperm.xlu1 %2230, %v778_v0   ;;  %v2790_v6 = vld [vmem:[%s3106_s8] ss:$0 sm:$0xff]  ;;  %v725_v48 = vand.u32 127, %v724_v46  ;;  %s2561_s4 = smov 2   ;;  %vm818_vm3 = vcmask 1039360   ;;  %vm2817_vm4 = vmneg %vm809_vm1 }
  0x51   : > { %s2774_s2 = sshll.u32 %s3136_s27, 3  ;;  %s2562_s29 = smov 126   ;;  %v842_v58 = vld [vmem:[%s3109_s11] sm:$0xff]  ;;  %vm2566_vm5 = vmmov 1   ;;  %vm825_vm7 = vcmask 1031168   ;;  %vm832_vm8 = vcmask 1022976   ;;  %vm2837_vm10 = vmpackc.low %vm2817_vm4, %vm2817_vm4 }
  0x52   : > { %s706_s30 = scalar_lea.vmem %s3103_s5, %s2774_s2  ;;  %s710_s22 = scalar_lea.vmem %s3104_s6, %s2774_s2  ;;  %2037 = vmatprep.mubr.msk.f32.mxu1 %vm856_vm2, %v842_v58  ;;  %v844_v60 = vld [vmem:[%s3110_s12] sm:$0xff]  ;;  %vm2090_vm6 = vmpackc.low %vm2566_vm5, %vm2817_vm4  ;;  %vm839_vm9 = vcmask 1014784   ;;  %vm1034_vm11 = vcmask 654336   ;;  %vm1284_vm12 = vcmask 261120   ;;  %vm2568_vm13 = vmmov 0  }
  0x53   : > { %v731_v2 = vld [vmem:[%s706_s30] sm:$0xff]  ;;  %s2563_s30 = smov 127   ;;  %s2565_s27 = smov 125   ;;  %vm1762_vm14 = vcmask 7168  }
  0x54   : > { %2231 = vset.pattern.permute.xlu1 %v2559_v3  ;;  %741 = vperm.xlu0 %2229, %v731_v2   ;;  %v732_v4 = vld [vmem:[%s710_s22] sm:$0xff]  ;;  %v748_v10 = vstv %s747_s25  ;;  %s2564_s22 = smov 124   ;;  %s714_s3 = scalar_lea.vmem %s3105_s7, %s2774_s2 }
  0x55   : > { %786 = vperm.xlu1 %2231, %v778_v0   ;;  %v753_v11 = vstv %s1934_s0  ;;  %v726_v49 = vstv %s723_s23  ;;  %s1962_s23 = sld [smem:[#allocation5 + $0x8]]  ;;  %s1969_s21 = sld [smem:[#allocation5 + $0xa]] }
  0x56   : > { %vm727_vm0 = vcmp.lt.s32.totalorder %v725_v48, %v726_v49  ;;  %s1973_s1 = sld [smem:[#allocation5 + $0xb]]  ;;  %s1977_s26 = sld [smem:[#allocation5 + $0xc]] }
  0x57   : > { %v2795_v51 = vsel %vm727_vm0, 1.0, %v2560_v50  ;;  %s1981_s25 = sld [smem:[#allocation5 + $0xd]]  ;;  %s1989_s0 = sld [smem:[#allocation5 + $0xf]] }
  0x58   : > { %765 = vperm.xlu0 %2229, %v732_v4   ;;  %s3026_s28 = sld [smem:[#allocation5 + $0x3]] }
  0x59   : > { %2247 = vset.pattern.permute.xlu1 %v2558_v1 }
  0x5c   : > { %794 = vperm.xlu0 %2229, %v791_v5  }
  0xcf   : > { %v782_v33 = vpop.permute.xlu1 %781 }
  0xd3   : > { %v742_v7 = vpop.permute.xlu0 %741 }
  0xd4   : > { %v744_v8 = vsub.f32 %v2790_v6, %v742_v7  ;;  %v787_v36 = vpop.permute.xlu1 %786 }
  0xd6   : > { %v745_v9 = vmul.f32 %v744_v8, %v744_v8 }
  0xd7   : > { %v766_v19 = vpop.permute.xlu0 %765 }
  0xd8   : > { %v746_v12 = vmul.f32 -0.5, %v745_v9 }
  0xda   : > { %v749_v13 = vmul.f32 %v748_v10, %v746_v12  ;;  %v754_v14 = vmul.f32 %v753_v11, %v746_v12 }
  0xdb   : > { %v795_v41 = vpop.permute.xlu0 %794 }
  0xdc   : > { %v750_v15 = vmul.f32 1.442695, %v749_v13  ;;  %v755_v16 = vmul.f32 1.442695, %v754_v14 }
  0xde   : > { %2428 = vpow2.f32 %v750_v15 }
  0xdf   : > { %2430 = vpow2.f32 %v755_v16  ;;  %v843_v16 = vld [vmem:[%s3109_s11 + $0x8] sm:$0xff] }
  0xe8   : > { %v2429_v17 = vpop.eup %2428 }
  0xe9   : > { %v2431_v18 = vpop.eup %2430  ;;  %v757_v20 = vrot.slane %v2429_v17, 4 }
  0xea   : > { %v768_v21 = vmul.f32 %v2431_v18, %v766_v19 }
  0xeb   : > { %v758_v22 = vadd.f32 %v2429_v17, %v757_v20 }
  0xec   : > { %v769_v23 = vrot.slane %v768_v21, 4 }
  0xed   : > { %v759_v24 = vrot.slane %v758_v22, 2 }
  0xee   : > { %v770_v26 = vadd.f32 %v769_v23, %v768_v21 }
  0xef   : > { %v760_v25 = vadd.f32 %v759_v24, %v758_v22 }
  0xf0   : > { %v771_v29 = vrot.slane %v770_v26, 2 }
  0xf1   : > { %v761_v27 = vrot.slane %v760_v25, 1 }
  0xf2   : > { %v772_v31 = vadd.f32 %v771_v29, %v770_v26 }
  0xf3   : > { %v762_v28 = vadd.f32 %v761_v27, %v760_v25 }
  0xf4   : > { %v773_v32 = vrot.slane %v772_v31, 1 }
  0xf5   : > { %v775_v30 = vadd.f32 1e-08, %v762_v28  ;;  %v784_v38 = vmul.f32 %v782_v33, %v762_v28 }
  0xf6   : > { %v774_v34 = vadd.f32 %v773_v32, %v772_v31  ;;  %v1435_v31 = vld [vmem:[%s3116_s18] sm:$0xff] }
  0xf7   : > { %2432 = vrcp.f32 %v775_v30 }
 0x101   : > { %v2433_v35 = vpop.eup %2432 }
 0x102   : > { %v777_v37 = vmul.f32 %v2433_v35, %v774_v34 }
 0x104   : > { %v789_v39 = vmul.f32 %v787_v36, %v777_v37 }
 0x106   : > { %v790_v40 = vadd.f32 %v789_v39, %v784_v38  ;;  %v1006_v39 = vld [vmem:[%s3111_s13] sm:$0xff] }
 0x108   : > { %v797_v42 = vadd.f32 %v795_v41, %v790_v40  ;;  %v1011_v40 = vld [vmem:[%s3112_s14 + $0x8] sm:$0xff]  ;;  %v1010_v41 = vld [vmem:[%s3112_s14] sm:$0xff] }
 0x10a   : > { %v798_v43 = vsub.f32 0.0, %v797_v42  ;;  %v1013_v42 = vld [vmem:[%s3112_s14 + $0x18] sm:$0xff] }
 0x10c   : > { %v799_v44 = vmul.f32 1.442695, %v798_v43  ;;  %v1012_v43 = vld [vmem:[%s3112_s14 + $0x10] sm:$0xff] }
 0x10e   : > { %2434 = vpow2.f32 %v799_v44 }
 0x118   : > { %v2435_v45 = vpop.eup %2434 }
 0x119   : > { %v801_v47 = vadd.f32 1.0, %v2435_v45 }
 0x11b   : > { %2436 = vrcp.f32 %v801_v47 }
 0x125   : > { %v2437_v52 = vpop.eup %2436 }
 0x126   : > { %v804_v53 = vmul.f32 %v2437_v52, %v2795_v51 }
 0x128   : > { %806 = vrot.lane.b32.xlu1 %v804_v53, %s2561_s4 }
 0x19a   : > { %v807_v54 = vpop.permute.xlu1 %806 }
 0x19b   : > { %v810_v55 = vsel %vm809_vm1, 0.0, %v807_v54  ;;  %v811_v56 = vsel %vm809_vm1, %v807_v54, 0.0 }
 0x19c   : > { %v2237_v57 = vpack.i.bf16 %v811_v56, %v810_v55 }
 0x19e   : > { %2238 = vrot.lane.b32.xlu1 %v2237_v57, %s2562_s29  ;;  %2233 = vrot.lane.b32.xlu0 %v2237_v57, %s2563_s30 }
 0x1a2   : > { %835 = vrot.lane.b32.xlu1 %v810_v55, %s2564_s22  ;;  %2243 = vrot.lane.b32.xlu0 %v2237_v57, %s2565_s27 }
 0x1a6   : > { %837 = vrot.lane.b32.xlu0 %v811_v56, %s2564_s22  ;;  %848 = vperm.xlu1 %2247, %v844_v60  }
 0x1aa   : > { %853 = vperm.xlu0 %2229, %v845_v59  }
 0x210   : > { %v2239_v61 = vpop.permute.xlu1 %2238  ;;  %v2234_v62 = vpop.permute.xlu0 %2233 }
 0x211   : > { %v2236_v0 = vunpack.i.h.bf16 %v2234_v62  ;;  %v2235_v1 = vunpack.i.l.bf16 %v2234_v62  ;;  %v2241_v2 = vunpack.i.h.bf16 %v2239_v61  ;;  %v2240_v3 = vunpack.i.l.bf16 %v2239_v61 }
 0x213   : > { %v819_v4 = vsel %vm818_vm3, %v2235_v1, %v2236_v0  ;;  %v826_v10 = vsel %vm825_vm7, %v2240_v3, %v2241_v2 }
 0x214   : > { %v2244_v5 = vpop.permute.xlu0 %2243  ;;  %v2089_v7 = vpack.c.bf16 %v819_v4, %v807_v54  ;;  %v836_v14 = vpop.permute.xlu1 %835 }
 0x215   : > { %v2246_v8 = vunpack.i.h.bf16 %v2244_v5  ;;  %v2245_v9 = vunpack.i.l.bf16 %v2244_v5 }
 0x216   : > { %2091 = vmatprep.subr.msk.bf16.mxu1 %vm2090_vm6, %v2089_v7 }
 0x217   : > { %2094 = vmatpush3.bf16.msk.msra.mxu1 %vm2090_vm6, %v2089_v7  ;;  %v833_v11 = vsel %vm832_vm8, %v2245_v9, %v2246_v8 }
 0x218   : > { %v838_v12 = vpop.permute.xlu0 %837  ;;  %v2095_v13 = vpack.c.bf16 %v833_v11, %v826_v10 }
 0x219   : > { %v840_v15 = vsel %vm839_vm9, %v836_v14, %v838_v12 }
 0x21a   : > { %2096 = vmatprep.subr.bf16.mxu1 %v2095_v13 }
 0x21b   : > { %2098 = vmatpush3.bf16.msra.mxu1 %v2095_v13 }
 0x21c   : > { %2035 = vmatprep.subr.mxu1 %v840_v15 }
 0x21f   : > { %2036 = vmatpush3.msra.mxu1 %v840_v15 }
 0x220   : > { %2038 = vmatmul.mubr.msk.f32.vlgmr.msra.gmra.mrb[0].mxu1 %vm856_vm2, %v843_v16 }
 0x221   : > { %2060 = vmatprep.mubr.msk.f32.mxu1 %vm1034_vm11, %v1006_v39 }
 0x225   : > { %v849_v17 = vpop.permute.xlu1 %848 }
 0x229   : > { %v854_v18 = vpop.permute.xlu0 %853 }
 0x2f3   : > { %v2039_v19 = vpop.f32.mrb[0].mxu1 }
 0x2f4   : > { %v935_v20 = vadd.f32 %v2039_v19, %v854_v18  ;;  %v929_v21 = vpop.f32.mrb[1].mxu1 }
 0x2f5   : > { %v930_v22 = vadd.f32 %v929_v21, %v849_v17  ;;  %v1008_v21 = vld [vmem:[%s3111_s13 + $0x10] sm:$0xff] }
 0x2f6   : > { %v939_v23 = vmax.f32 %v935_v20, 0.0  ;;  %v1007_v20 = vld [vmem:[%s3111_s13 + $0x8] sm:$0xff] }
 0x2f7   : > { %v938_v24 = vmax.f32 %v930_v22, 0.0  ;;  %v1009_v22 = vld [vmem:[%s3111_s13 + $0x18] sm:$0xff] }
 0x2f8   : > { %v941_v25 = vmul.f32 %v2795_v51, %v939_v23 }
 0x2f9   : > { %v940_v26 = vmul.f32 %v2795_v51, %v938_v24 }
 0x2fb   : > { %v2248_v27 = vpack.i.bf16 %v941_v25, %v940_v26  ;;  %v2567_v26 = vmov 0.0|0.0  }
 0x2fc   : > { %2121 = vmatprep.subr.bf16.mxu0 %v2567_v26 }
 0x2fd   : > { %2249 = vrot.lane.b32.xlu1 %v2248_v27, %s2561_s4 }
 0x36f   : > { %v2250_v28 = vpop.permute.xlu1 %2249 }
 0x370   : > { %v2252_v29 = vunpack.i.h.bf16 %v2250_v28  ;;  %v2251_v30 = vunpack.i.l.bf16 %v2250_v28 }
 0x372   : > { %v951_v32 = vsel %vm809_vm1, 0.0, %v2252_v29  ;;  %v953_v33 = vsel %vm809_vm1, %v2252_v29, 0.0  ;;  %v950_v34 = vsel %vm809_vm1, 0.0, %v2251_v30  ;;  %v952_v35 = vsel %vm809_vm1, %v2251_v30, 0.0 }
 0x373   : > { %v2099_v36 = vpack.c.bf16 %v2252_v29, %v2251_v30  ;;  %v2253_v37 = vpack.i.bf16 %v953_v33, %v951_v32  ;;  %v2268_v38 = vpack.i.bf16 %v952_v35, %v950_v34 }
 0x375   : > { %2101 = vmatprep.subr.msk.bf16.mxu1 %vm2837_vm10, %v2099_v36  ;;  %2254 = vrot.lane.b32.xlu1 %v2253_v37, %s2563_s30 }
 0x376   : > { %2104 = vmatpush3.bf16.msk.msra.mxu1 %vm2837_vm10, %v2099_v36  ;;  %2269 = vrot.lane.b32.xlu0 %v2268_v38, %s2563_s30 }
 0x379   : > { %2259 = vrot.lane.b32.xlu1 %v2253_v37, %s2562_s29 }
 0x37a   : > { %2274 = vrot.lane.b32.xlu0 %v2268_v38, %s2562_s29 }
 0x37d   : > { %2264 = vrot.lane.b32.xlu1 %v2253_v37, %s2565_s27 }
 0x37e   : > { %2279 = vrot.lane.b32.xlu0 %v2268_v38, %s2565_s27 }
 0x381   : > { %2289 = vrot.lane.b32.xlu1 %v2253_v37, %s2564_s22 }
 0x382   : > { %2284 = vrot.lane.b32.xlu0 %v2268_v38, %s2564_s22 }
 0x385   : > { %1021 = vperm.xlu1 %2247, %v1011_v40  }
 0x386   : > { %1016 = vperm.xlu0 %2229, %v1010_v41  }
 0x389   : > { %1031 = vperm.xlu1 %2247, %v1013_v42  }
 0x38a   : > { %1026 = vperm.xlu0 %2229, %v1012_v43  }
 0x3e7   : > { %v2255_v44 = vpop.permute.xlu1 %2254 }
 0x3e8   : > { %v2257_v45 = vunpack.i.h.bf16 %v2255_v44  ;;  %v2256_v47 = vunpack.i.l.bf16 %v2255_v44  ;;  %v2270_v48 = vpop.permute.xlu0 %2269 }
 0x3e9   : > { %v2272_v49 = vunpack.i.h.bf16 %v2270_v48  ;;  %v2271_v52 = vunpack.i.l.bf16 %v2270_v48 }
 0x3ea   : > { %v967_v53 = vsel %vm818_vm3, %v2256_v47, %v2257_v45 }
 0x3eb   : > { %v2260_v54 = vpop.permute.xlu1 %2259  ;;  %v966_v55 = vsel %vm818_vm3, %v2271_v52, %v2272_v49 }
 0x3ec   : > { %v2262_v56 = vunpack.i.h.bf16 %v2260_v54  ;;  %v2261_v57 = vunpack.i.l.bf16 %v2260_v54  ;;  %v2275_v58 = vpop.permute.xlu0 %2274  ;;  %v2105_v59 = vpack.c.bf16 %v967_v53, %v966_v55 }
 0x3ed   : > { %v2277_v60 = vunpack.i.h.bf16 %v2275_v58  ;;  %v2276_v61 = vunpack.i.l.bf16 %v2275_v58 }
 0x3ee   : > { %2106 = vmatprep.subr.bf16.mxu1 %v2105_v59  ;;  %v979_v62 = vsel %vm825_vm7, %v2261_v57, %v2262_v56 }
 0x3ef   : > { %2108 = vmatpush3.bf16.msra.mxu1 %v2105_v59  ;;  %v2265_v63 = vpop.permute.xlu1 %2264  ;;  %v978_v0 = vsel %vm825_vm7, %v2276_v61, %v2277_v60 }
 0x3f0   : > { %v2267_v1 = vunpack.i.h.bf16 %v2265_v63  ;;  %v2266_v2 = vunpack.i.l.bf16 %v2265_v63  ;;  %v2280_v3 = vpop.permute.xlu0 %2279  ;;  %v2109_v4 = vpack.c.bf16 %v979_v62, %v978_v0 }
 0x3f1   : > { %v2282_v5 = vunpack.i.h.bf16 %v2280_v3  ;;  %v2281_v7 = vunpack.i.l.bf16 %v2280_v3 }
 0x3f2   : > { %2110 = vmatprep.subr.bf16.mxu1 %v2109_v4  ;;  %v991_v8 = vsel %vm832_vm8, %v2266_v2, %v2267_v1 }
 0x3f3   : > { %2112 = vmatpush3.bf16.msra.mxu1 %v2109_v4  ;;  %v2290_v9 = vpop.permute.xlu1 %2289  ;;  %v990_v10 = vsel %vm832_vm8, %v2281_v7, %v2282_v5  ;;  %v1269_v7 = vld [vmem:[%s3113_s15 + $0x8] sm:$0xff] }
 0x3f4   : > { %v2292_v11 = vunpack.i.h.bf16 %v2290_v9  ;;  %v2291_v12 = vunpack.i.l.bf16 %v2290_v9  ;;  %v2285_v13 = vpop.permute.xlu0 %2284  ;;  %v2113_v14 = vpack.c.bf16 %v991_v8, %v990_v10  ;;  %1955 = vmatprep.mubr.msk.f32.mxu0 %vm1284_vm12, %v1269_v7  ;;  %v1273_v8 = vld [vmem:[%s3114_s16 + $0x8] sm:$0xff]  ;;  %v1272_v9 = vld [vmem:[%s3114_s16] sm:$0xff] }
 0x3f5   : > { %v2287_v15 = vunpack.i.h.bf16 %v2285_v13  ;;  %v2286_v16 = vunpack.i.l.bf16 %v2285_v13 }
 0x3f6   : > { %2114 = vmatprep.subr.bf16.mxu1 %v2113_v14  ;;  %v1003_v17 = vsel %vm839_vm9, %v2291_v12, %v2292_v11 }
 0x3f7   : > { %2116 = vmatpush3.bf16.msra.mxu1 %v2113_v14  ;;  %v1002_v18 = vsel %vm839_vm9, %v2286_v16, %v2287_v15 }
 0x3f8   : > { %v2117_v19 = vpack.c.bf16 %v1003_v17, %v1002_v18 }
 0x3fa   : > { %2118 = vmatprep.subr.bf16.mxu1 %v2117_v19 }
 0x3fb   : > { %2120 = vmatpush3.bf16.msra.mxu1 %v2117_v19 }
 0x3fc   : > { %2153 = vmatprep.subr.bf16.mxu1 %v2567_v26 }
 0x3fe   : > { %2061 = vmatmul.mubr.msk.f32.vlgmr.msra.gmra.mrb[2].mxu1 %vm1034_vm11, %v1007_v20 }
 0x3ff   : > { %2063 = vmatprep.mubr.msk.f32.mxu1 %vm1034_vm11, %v1008_v21 }
 0x402   : > { %2064 = vmatmul.mubr.msk.f32.gmra.mrb[4].mxu1 %vm1034_vm11, %v1009_v22 }
 0x403   : > { %2086 = vmatprep.mubr.msk.f32.mxu1 %vm2568_vm13, %v2560_v50 }
 0x404   : > { %v1022_v23 = vpop.permute.xlu1 %1021 }
 0x405   : > { %v1017_v24 = vpop.permute.xlu0 %1016 }
 0x408   : > { %v1032_v32 = vpop.permute.xlu1 %1031 }
 0x409   : > { %v1027_v35 = vpop.permute.xlu0 %1026 }
 0x4d1   : > { %v2062_v25 = vpop.f32.mrb[2].mxu1 }
 0x4d2   : > { %v1119_v27 = vadd.f32 %v2062_v25, %v1022_v23  ;;  %v1113_v28 = vpop.f32.mrb[3].mxu1 }
 0x4d3   : > { %v1114_v29 = vadd.f32 %v1113_v28, %v1017_v24 }
 0x4d4   : > { %v1133_v30 = vmax.f32 %v1119_v27, 0.0 }
 0x4d5   : > { %v1132_v33 = vmax.f32 %v1114_v29, 0.0  ;;  %v2065_v34 = vpop.f32.mrb[4].mxu1 }
 0x4d6   : > { %v1137_v36 = vmul.f32 %v2795_v51, %v1133_v30  ;;  %v1129_v37 = vadd.f32 %v2065_v34, %v1032_v32  ;;  %v1123_v38 = vpop.f32.mrb[5].mxu1 }
 0x4d7   : > { %v1136_v39 = vmul.f32 %v2795_v51, %v1132_v33  ;;  %v1124_v40 = vadd.f32 %v1123_v38, %v1027_v35 }
 0x4d8   : > { %v1135_v41 = vmax.f32 %v1129_v37, 0.0 }
 0x4d9   : > { %v1134_v42 = vmax.f32 %v1124_v40, 0.0  ;;  %v2293_v43 = vpack.i.bf16 %v1137_v36, %v1136_v39 }
 0x4da   : > { %v1139_v44 = vmul.f32 %v2795_v51, %v1135_v41 }
 0x4db   : > { %v1138_v45 = vmul.f32 %v2795_v51, %v1134_v42  ;;  %2294 = vrot.lane.b32.xlu0 %v2293_v43, %s2561_s4 }
 0x4dd   : > { %v2298_v47 = vpack.i.bf16 %v1139_v44, %v1138_v45 }
 0x4df   : > { %2299 = vrot.lane.b32.xlu1 %v2298_v47, %s2561_s4 }
 0x54d   : > { %v2295_v48 = vpop.permute.xlu0 %2294 }
 0x54e   : > { %v2297_v49 = vunpack.i.h.bf16 %v2295_v48  ;;  %v2296_v52 = vunpack.i.l.bf16 %v2295_v48 }
 0x550   : > { %v1157_v53 = vsel %vm809_vm1, 0.0, %v2297_v49  ;;  %v1161_v54 = vsel %vm809_vm1, %v2297_v49, 0.0  ;;  %v1156_v55 = vsel %vm809_vm1, 0.0, %v2296_v52  ;;  %v1160_v56 = vsel %vm809_vm1, %v2296_v52, 0.0 }
 0x551   : > { %v2300_v57 = vpop.permute.xlu1 %2299  ;;  %v2122_v58 = vpack.c.bf16 %v2297_v49, %v2296_v52  ;;  %v2303_v59 = vpack.i.bf16 %v1161_v54, %v1157_v53  ;;  %v2308_v60 = vpack.i.bf16 %v1160_v56, %v1156_v55 }
 0x552   : > { %v2302_v61 = vunpack.i.h.bf16 %v2300_v57  ;;  %v2301_v62 = vunpack.i.l.bf16 %v2300_v57 }
 0x553   : > { %2124 = vmatpush1.bf16.msk.msra.mxu0 %vm2837_vm10, %v2122_v58  ;;  %2304 = vrot.lane.b32.xlu1 %v2303_v59, %s2563_s30 }
 0x554   : > { %v1159_v63 = vsel %vm809_vm1, 0.0, %v2302_v61  ;;  %v1163_v0 = vsel %vm809_vm1, %v2302_v61, 0.0  ;;  %v1158_v1 = vsel %vm809_vm1, 0.0, %v2301_v62  ;;  %v1162_v2 = vsel %vm809_vm1, %v2301_v62, 0.0  ;;  %2309 = vrot.lane.b32.xlu0 %v2308_v60, %s2563_s30  ;;  %2125 = vmatprep.subr.bf16.mxu0 %v2567_v26 }
 0x555   : > { %v2126_v3 = vpack.c.bf16 %v2302_v61, %v2301_v62  ;;  %v2313_v4 = vpack.i.bf16 %v1163_v0, %v1159_v63  ;;  %v2318_v5 = vpack.i.bf16 %v1162_v2, %v1158_v1 }
 0x557   : > { %2128 = vmatpush1.bf16.msk.msra.mxu0 %vm2837_vm10, %v2126_v3  ;;  %2314 = vrot.lane.b32.xlu1 %v2313_v4, %s2563_s30 }
 0x558   : > { %2319 = vrot.lane.b32.xlu0 %v2318_v5, %s2563_s30  ;;  %2129 = vmatprep.subr.bf16.mxu0 %v2567_v26 }
 0x55b   : > { %2329 = vrot.lane.b32.xlu1 %v2303_v59, %s2562_s29 }
 0x55c   : > { %2324 = vrot.lane.b32.xlu0 %v2308_v60, %s2562_s29 }
 0x55f   : > { %2334 = vrot.lane.b32.xlu1 %v2313_v4, %s2562_s29 }
 0x560   : > { %2339 = vrot.lane.b32.xlu0 %v2318_v5, %s2562_s29 }
 0x563   : > { %2349 = vrot.lane.b32.xlu1 %v2303_v59, %s2565_s27 }
 0x564   : > { %2344 = vrot.lane.b32.xlu0 %v2308_v60, %s2565_s27 }
 0x567   : > { %2354 = vrot.lane.b32.xlu1 %v2313_v4, %s2565_s27 }
 0x568   : > { %2359 = vrot.lane.b32.xlu0 %v2318_v5, %s2565_s27 }
 0x56b   : > { %2369 = vrot.lane.b32.xlu1 %v2303_v59, %s2564_s22 }
 0x56c   : > { %2364 = vrot.lane.b32.xlu0 %v2308_v60, %s2564_s22 }
 0x56f   : > { %2379 = vrot.lane.b32.xlu1 %v2313_v4, %s2564_s22 }
 0x570   : > { %2374 = vrot.lane.b32.xlu0 %v2318_v5, %s2564_s22 }
 0x573   : > { %1281 = vperm.xlu1 %2247, %v1273_v8  }
 0x574   : > { %1276 = vperm.xlu0 %2229, %v1272_v9  }
 0x5c5   : > { %v2305_v10 = vpop.permute.xlu1 %2304 }
 0x5c6   : > { %v2307_v11 = vunpack.i.h.bf16 %v2305_v10  ;;  %v2306_v12 = vunpack.i.l.bf16 %v2305_v10  ;;  %v2310_v13 = vpop.permute.xlu0 %2309 }
 0x5c7   : > { %v2312_v14 = vunpack.i.h.bf16 %v2310_v13  ;;  %v2311_v15 = vunpack.i.l.bf16 %v2310_v13 }
 0x5c8   : > { %v1189_v16 = vsel %vm818_vm3, %v2306_v12, %v2307_v11 }
 0x5c9   : > { %v2315_v17 = vpop.permute.xlu1 %2314  ;;  %v1188_v18 = vsel %vm818_vm3, %v2311_v15, %v2312_v14 }
 0x5ca   : > { %v2317_v19 = vunpack.i.h.bf16 %v2315_v17  ;;  %v2316_v20 = vunpack.i.l.bf16 %v2315_v17  ;;  %v2320_v21 = vpop.permute.xlu0 %2319  ;;  %v2130_v22 = vpack.c.bf16 %v1189_v16, %v1188_v18 }
 0x5cb   : > { %v2322_v23 = vunpack.i.h.bf16 %v2320_v21  ;;  %v2321_v24 = vunpack.i.l.bf16 %v2320_v21 }
 0x5cc   : > { %2131 = vmatpush1.bf16.msra.mxu0 %v2130_v22  ;;  %v1191_v25 = vsel %vm818_vm3, %v2316_v20, %v2317_v19 }
 0x5cd   : > { %v2330_v27 = vpop.permute.xlu1 %2329  ;;  %2132 = vmatprep.subr.bf16.mxu0 %v2567_v26  ;;  %v1190_v28 = vsel %vm818_vm3, %v2321_v24, %v2322_v23  ;;  %v1268_v24 = vld [vmem:[%s3113_s15] sm:$0xff] }
 0x5ce   : > { %v2332_v29 = vunpack.i.h.bf16 %v2330_v27  ;;  %v2331_v30 = vunpack.i.l.bf16 %v2330_v27  ;;  %v2325_v32 = vpop.permute.xlu0 %2324  ;;  %v2133_v33 = vpack.c.bf16 %v1191_v25, %v1190_v28  ;;  %v1271_v25 = vld [vmem:[%s3113_s15 + $0x18] sm:$0xff]  ;;  %v1270_v27 = vld [vmem:[%s3113_s15 + $0x10] sm:$0xff] }
 0x5cf   : > { %v2327_v34 = vunpack.i.h.bf16 %v2325_v32  ;;  %v2326_v35 = vunpack.i.l.bf16 %v2325_v32 }
 0x5d0   : > { %2134 = vmatpush1.bf16.msra.mxu0 %v2133_v33  ;;  %v1213_v36 = vsel %vm825_vm7, %v2331_v30, %v2332_v29 }
 0x5d1   : > { %v2335_v37 = vpop.permute.xlu1 %2334  ;;  %2135 = vmatprep.subr.bf16.mxu0 %v2567_v26  ;;  %v1212_v38 = vsel %vm825_vm7, %v2326_v35, %v2327_v34 }
 0x5d2   : > { %v2337_v39 = vunpack.i.h.bf16 %v2335_v37  ;;  %v2336_v40 = vunpack.i.l.bf16 %v2335_v37  ;;  %v2340_v41 = vpop.permute.xlu0 %2339  ;;  %v2136_v42 = vpack.c.bf16 %v1213_v36, %v1212_v38 }
 0x5d3   : > { %v2342_v43 = vunpack.i.h.bf16 %v2340_v41  ;;  %v2341_v44 = vunpack.i.l.bf16 %v2340_v41 }
 0x5d4   : > { %2137 = vmatpush1.bf16.msra.mxu0 %v2136_v42  ;;  %v1215_v45 = vsel %vm825_vm7, %v2336_v40, %v2337_v39 }
 0x5d5   : > { %v2350_v47 = vpop.permute.xlu1 %2349  ;;  %2138 = vmatprep.subr.bf16.mxu0 %v2567_v26  ;;  %v1214_v48 = vsel %vm825_vm7, %v2341_v44, %v2342_v43 }
 0x5d6   : > { %v2352_v49 = vunpack.i.h.bf16 %v2350_v47  ;;  %v2351_v52 = vunpack.i.l.bf16 %v2350_v47  ;;  %v2345_v53 = vpop.permute.xlu0 %2344  ;;  %v2139_v54 = vpack.c.bf16 %v1215_v45, %v1214_v48 }
 0x5d7   : > { %v2347_v55 = vunpack.i.h.bf16 %v2345_v53  ;;  %v2346_v56 = vunpack.i.l.bf16 %v2345_v53 }
 0x5d8   : > { %2140 = vmatpush1.bf16.msra.mxu0 %v2139_v54  ;;  %v1237_v57 = vsel %vm832_vm8, %v2351_v52, %v2352_v49 }
 0x5d9   : > { %v2355_v58 = vpop.permute.xlu1 %2354  ;;  %2141 = vmatprep.subr.bf16.mxu0 %v2567_v26  ;;  %v1236_v59 = vsel %vm832_vm8, %v2346_v56, %v2347_v55  ;;  %v1515_v55 = vld [vmem:[%s714_s3] sm:$0xff]  ;;  %s3022_s3 = sld [smem:[#allocation5 + $0x1]] }
 0x5da   : > { %v2357_v60 = vunpack.i.h.bf16 %v2355_v58  ;;  %v2356_v61 = vunpack.i.l.bf16 %v2355_v58  ;;  %v2360_v62 = vpop.permute.xlu0 %2359  ;;  %v2142_v63 = vpack.c.bf16 %v1237_v57, %v1236_v59 }
 0x5db   : > { %v2362_v0 = vunpack.i.h.bf16 %v2360_v62  ;;  %v2361_v1 = vunpack.i.l.bf16 %v2360_v62 }
 0x5dc   : > { %2143 = vmatpush1.bf16.msra.mxu0 %v2142_v63  ;;  %v1239_v2 = vsel %vm832_vm8, %v2356_v61, %v2357_v60 }
 0x5dd   : > { %v2370_v3 = vpop.permute.xlu1 %2369  ;;  %2144 = vmatprep.subr.bf16.mxu0 %v2567_v26  ;;  %v1238_v4 = vsel %vm832_vm8, %v2361_v1, %v2362_v0 }
 0x5de   : > { %v2372_v5 = vunpack.i.h.bf16 %v2370_v3  ;;  %v2371_v7 = vunpack.i.l.bf16 %v2370_v3  ;;  %v2365_v8 = vpop.permute.xlu0 %2364  ;;  %v2145_v9 = vpack.c.bf16 %v1239_v2, %v1238_v4 }
 0x5df   : > { %v2367_v10 = vunpack.i.h.bf16 %v2365_v8  ;;  %v2366_v11 = vunpack.i.l.bf16 %v2365_v8 }
 0x5e0   : > { %2146 = vmatpush1.bf16.msra.mxu0 %v2145_v9  ;;  %v1261_v12 = vsel %vm839_vm9, %v2371_v7, %v2372_v5 }
 0x5e1   : > { %v2380_v13 = vpop.permute.xlu1 %2379  ;;  %2147 = vmatprep.subr.bf16.mxu0 %v2567_v26  ;;  %v1260_v14 = vsel %vm839_vm9, %v2366_v11, %v2367_v10 }
 0x5e2   : > { %v2382_v15 = vunpack.i.h.bf16 %v2380_v13  ;;  %v2381_v16 = vunpack.i.l.bf16 %v2380_v13  ;;  %v2375_v17 = vpop.permute.xlu0 %2374  ;;  %v2148_v18 = vpack.c.bf16 %v1261_v12, %v1260_v14 }
 0x5e3   : > { %v2377_v19 = vunpack.i.h.bf16 %v2375_v17  ;;  %v2376_v20 = vunpack.i.l.bf16 %v2375_v17 }
 0x5e4   : > { %2149 = vmatpush1.bf16.msra.mxu0 %v2148_v18  ;;  %v1263_v21 = vsel %vm839_vm9, %v2381_v16, %v2382_v15 }
 0x5e5   : > { %2150 = vmatprep.subr.bf16.mxu0 %v2567_v26  ;;  %v1262_v22 = vsel %vm839_vm9, %v2376_v20, %v2377_v19 }
 0x5e6   : > { %v2151_v23 = vpack.c.bf16 %v1263_v21, %v1262_v22 }
 0x5e8   : > { %2152 = vmatpush1.bf16.msra.mxu0 %v2151_v23 }
 0x5eb   : > { %1356 = vmatmul.mubr.f32.vlgmr.msra.gmra.mrb[0].mxu0 %v1268_v24 }
 0x5ec   : > { %1956 = vmatprep.mubr.msk.f32.mxu0 %vm1284_vm12, %v1271_v25 }
 0x5ef   : > { %1361 = vmatmul.mubr.f32.gmra.mrb[2].mxu0 %v1270_v27 }
 0x5f2   : > { %v1282_v33 = vpop.permute.xlu1 %1281 }
 0x5f3   : > { %v1277_v28 = vpop.permute.xlu0 %1276 }
 0x6be   : > { %v1357_v29 = vpop.f32.mrb[0].mxu0 }
 0x6bf   : > { %v1358_v30 = vadd.f32 %v1357_v29, %v1277_v28  ;;  %v1359_v32 = vpop.f32.mrb[1].mxu0  ;;  %v1434_v29 = vld [vmem:[%s3115_s17] sm:$0xff] }
 0x6c1   : > { %v1366_v35 = vmax.f32 %v1358_v30, 0.0 }
 0x6c2   : > { %v1362_v34 = vpop.f32.mrb[2].mxu0 }
 0x6c3   : > { %v1363_v36 = vadd.f32 %v1362_v34, %v1282_v33  ;;  %v1364_v37 = vpop.f32.mrb[3].mxu0  ;;  %v1368_v39 = vmul.f32 %v2795_v51, %v1366_v35 }
 0x6c5   : > { %v1367_v38 = vmax.f32 %v1363_v36, 0.0 }
 0x6c7   : > { %v1369_v40 = vmul.f32 %v2795_v51, %v1367_v38  ;;  %v1586_v38 = vstv %s1969_s21  ;;  %s3056_s21 = sld [smem:[#allocation5 + $0x6]] }
 0x6c9   : > { %v2383_v41 = vpack.i.bf16 %v1369_v40, %v1368_v39 }
 0x6cb   : > { %2384 = vrot.lane.b32.xlu0 %v2383_v41, %s2561_s4  ;;  %s3019_s4 = sld [smem:[#allocation5 + $0xe]] }
 0x73d   : > { %v2385_v42 = vpop.permute.xlu0 %2384 }
 0x73e   : > { %v2387_v43 = vunpack.i.h.bf16 %v2385_v42  ;;  %v2386_v44 = vunpack.i.l.bf16 %v2385_v42 }
 0x740   : > { %v1379_v45 = vsel %vm809_vm1, 0.0, %v2387_v43  ;;  %v1381_v47 = vsel %vm809_vm1, %v2387_v43, 0.0  ;;  %v1378_v48 = vsel %vm809_vm1, 0.0, %v2386_v44  ;;  %v1380_v49 = vsel %vm809_vm1, %v2386_v44, 0.0 }
 0x741   : > { %v2154_v52 = vpack.c.bf16 %v2387_v43, %v2386_v44  ;;  %v2408_v53 = vpack.i.bf16 %v1381_v47, %v1379_v45  ;;  %v2388_v54 = vpack.i.bf16 %v1380_v49, %v1378_v48  ;;  %v1642_v43 = vstv %s1977_s26  ;;  %s1963_s26 = sld [smem:[#allocation7 + $0x8]] }
 0x742   : > { %v1670_v44 = vstv %s1981_s25  ;;  %v1536_v45 = vshrl.u32 %v724_v46, 7  ;;  %v1698_v49 = vstv %s3019_s4  ;;  %s1971_s25 = sld [smem:[#allocation7 + $0xa]]  ;;  %s1975_s4 = sld [smem:[#allocation7 + $0xb]] }
 0x743   : > { %2156 = vmatpush3.bf16.msk.msra.mxu1 %vm2837_vm10, %v2154_v52  ;;  %2409 = vrot.lane.b32.xlu0 %v2408_v53, %s2563_s30 }
 0x744   : > { %2389 = vrot.lane.b32.xlu1 %v2388_v54, %s2563_s30  ;;  %2157 = vmatprep.subr.bf16.mxu1 %v2567_v26  ;;  %s3024_s30 = sld [smem:[#allocation5]] }
 0x747   : > { %2414 = vrot.lane.b32.xlu0 %v2408_v53, %s2562_s29 }
 0x748   : > { %2394 = vrot.lane.b32.xlu1 %v2388_v54, %s2562_s29  ;;  %s3028_s29 = sld [smem:[#allocation5 + $0x2]] }
 0x74b   : > { %2419 = vrot.lane.b32.xlu0 %v2408_v53, %s2565_s27 }
 0x74c   : > { %2399 = vrot.lane.b32.xlu1 %v2388_v54, %s2565_s27  ;;  %s1965_s27 = sld [smem:[#allocation5 + $0x9]] }
 0x74f   : > { %2424 = vrot.lane.b32.xlu0 %v2408_v53, %s2564_s22 }
 0x750   : > { %2404 = vrot.lane.b32.xlu1 %v2388_v54, %s2564_s22  ;;  %s3035_s22 = sld [smem:[#allocation5 + $0x5]]  ;;  %v1726_v54 = vstv %s1989_s0  ;;  %s1979_s0 = sld [smem:[#allocation7 + $0xc]] }
 0x752   : > { %v1558_v35 = vstv %s1965_s27  ;;  %s3045_s27 = sld [smem:[#allocation5 + $0x4]] }
 0x753   : > { %1438 = vperm.xlu0 %2229, %v1435_v31   ;;  %v1553_v31 = vstv %s3022_s3  ;;  %s1983_s3 = sld [smem:[#allocation7 + $0xd]] }
 0x754   : > { %1518 = vperm.xlu1 %2247, %v1515_v55   ;;  %v1525_v55 = vstv %s3024_s30  ;;  %s1987_s30 = sld [smem:[#allocation7 + $0xe]] }
 0x7b5   : > { %v2410_v50 = vpop.permute.xlu0 %2409 }
 0x7b6   : > { %v2412_v56 = vunpack.i.h.bf16 %v2410_v50  ;;  %v2411_v57 = vunpack.i.l.bf16 %v2410_v50  ;;  %v2390_v58 = vpop.permute.xlu1 %2389  ;;  %v1609_v50 = vstv %s3026_s28  ;;  %s1991_s28 = sld [smem:[#allocation7 + $0xf]] }
 0x7b7   : > { %v2392_v59 = vunpack.i.h.bf16 %v2390_v58  ;;  %v2391_v60 = vunpack.i.l.bf16 %v2390_v58 }
 0x7b8   : > { %v1395_v61 = vsel %vm818_vm3, %v2411_v57, %v2412_v56  ;;  %v1581_v56 = vstv %s3028_s29  ;;  %s1966_s29 = sld [smem:[#allocation7 + $0x1]] }
 0x7b9   : > { %v1394_v62 = vsel %vm818_vm3, %v2391_v60, %v2392_v59  ;;  %v2415_v63 = vpop.permute.xlu0 %2414 }
 0x7ba   : > { %v2158_v0 = vpack.c.bf16 %v1395_v61, %v1394_v62  ;;  %v2417_v1 = vunpack.i.h.bf16 %v2415_v63  ;;  %v2416_v2 = vunpack.i.l.bf16 %v2415_v63  ;;  %v2395_v3 = vpop.permute.xlu1 %2394  ;;  %v1565_v61 = vsub.s32 1, %v1536_v45 }
 0x7bb   : > { %v2397_v4 = vunpack.i.h.bf16 %v2395_v3  ;;  %v2396_v5 = vunpack.i.l.bf16 %v2395_v3  ;;  %v1593_v3 = vsub.s32 2, %v1536_v45 }
 0x7bc   : > { %v1407_v7 = vsel %vm825_vm7, %v2416_v2, %v2417_v1  ;;  %2159 = vmatpush3.bf16.msra.mxu1 %v2158_v0  ;;  %v1537_v2 = vsub.s32 0, %v1536_v45 }
 0x7bd   : > { %v1406_v8 = vsel %vm825_vm7, %v2396_v5, %v2397_v4  ;;  %v2420_v9 = vpop.permute.xlu0 %2419  ;;  %2160 = vmatprep.subr.bf16.mxu1 %v2567_v26  ;;  %v1621_v4 = vsub.s32 3, %v1536_v45  ;;  %v1649_v5 = vsub.s32 4, %v1536_v45 }
 0x7be   : > { %v2161_v10 = vpack.c.bf16 %v1407_v7, %v1406_v8  ;;  %v2422_v11 = vunpack.i.h.bf16 %v2420_v9  ;;  %v2421_v12 = vunpack.i.l.bf16 %v2420_v9  ;;  %v2400_v13 = vpop.permute.xlu1 %2399  ;;  %v1677_v7 = vsub.s32 5, %v1536_v45 }
 0x7bf   : > { %v2402_v14 = vunpack.i.h.bf16 %v2400_v13  ;;  %v2401_v15 = vunpack.i.l.bf16 %v2400_v13  ;;  %v1705_v8 = vsub.s32 6, %v1536_v45  ;;  %v1733_v9 = vsub.s32 7, %v1536_v45 }
 0x7c0   : > { %v1419_v16 = vsel %vm832_vm8, %v2421_v12, %v2422_v11  ;;  %2162 = vmatpush3.bf16.msra.mxu1 %v2161_v10  ;;  %v1665_v12 = vstv %s3035_s22  ;;  %s1534_s22 = sld [smem:[#allocation7]] }
 0x7c1   : > { %v1418_v17 = vsel %vm832_vm8, %v2401_v15, %v2402_v14  ;;  %v2425_v18 = vpop.permute.xlu0 %2424  ;;  %2163 = vmatprep.subr.bf16.mxu1 %v2567_v26 }
 0x7c2   : > { %v2164_v19 = vpack.c.bf16 %v1419_v16, %v1418_v17  ;;  %v2427_v20 = vunpack.i.h.bf16 %v2425_v18  ;;  %v2426_v21 = vunpack.i.l.bf16 %v2425_v18  ;;  %v2405_v22 = vpop.permute.xlu1 %2404 }
 0x7c3   : > { %v2407_v23 = vunpack.i.h.bf16 %v2405_v22  ;;  %v2406_v24 = vunpack.i.l.bf16 %v2405_v22 }
 0x7c4   : > { %v1431_v25 = vsel %vm839_vm9, %v2426_v21, %v2427_v20  ;;  %2165 = vmatpush3.bf16.msra.mxu1 %v2164_v19 }
 0x7c5   : > { %v1430_v27 = vsel %vm839_vm9, %v2406_v24, %v2407_v23  ;;  %2166 = vmatprep.subr.bf16.mxu1 %v2567_v26  ;;  %v1530_v26 = vstv %s1962_s23  ;;  %s3047_s23 = sld [smem:[#allocation5 + $0x7]] }
 0x7c6   : > { %v2167_v28 = vpack.c.bf16 %v1431_v25, %v1430_v27 }
 0x7c8   : > { %2168 = vmatpush3.bf16.msra.mxu1 %v2167_v28 }
 0x7cb   : > { %2087 = vmatmul.mubr.msk.f32.vlgmr.msra.gmra.mrb[6].mxu1 %vm1034_vm11, %v1434_v29 }
 0x7d2   : > { %v1439_v59 = vpop.permute.xlu0 %1438 }
 0x7d3   : > { %v1519_v30 = vpop.permute.xlu1 %1518 }
 0x7d4   : > { %v1521_v32 = vsub.f32 %v2790_v6, %v1519_v30  ;;  %v1614_v6 = vstv %s1973_s1  ;;  %s1967_s1 = sld [smem:[#allocation7 + $0x9]] }
 0x7d6   : > { %v1522_v33 = vmul.f32 %v1521_v32, %v1521_v32 }
 0x7d8   : > { %v3016_v34 = vmul.f32 -0.5, %v1522_v33  ;;  %v1637_v33 = vstv %s3045_s27  ;;  %s1992_s27 = sld [smem:[#allocation8 + $0x1]] }
 0x7da   : > { %v1559_v36 = vmul.f32 %v1558_v35, %v3016_v34  ;;  %v1531_v37 = vmul.f32 %v1530_v26, %v3016_v34  ;;  %v1587_v40 = vmul.f32 %v1586_v38, %v3016_v34  ;;  %v1615_v42 = vmul.f32 %v1614_v6, %v3016_v34 }
 0x7db   : > { %v1643_v48 = vmul.f32 %v1642_v43, %v3016_v34  ;;  %v1671_v53 = vmul.f32 %v1670_v44, %v3016_v34  ;;  %v1699_v46 = vmul.f32 %v1698_v49, %v3016_v34  ;;  %v1727_v58 = vmul.f32 %v1726_v54, %v3016_v34 }
 0x7dc   : > { %v1560_v39 = vmul.f32 1.442695, %v1559_v36  ;;  %v1532_v41 = vmul.f32 1.442695, %v1531_v37  ;;  %v1588_v47 = vmul.f32 1.442695, %v1587_v40  ;;  %v1554_v63 = vmul.f32 %v1553_v31, %v3016_v34 }
 0x7dd   : > { %v1616_v52 = vmul.f32 1.442695, %v1615_v42  ;;  %v1644_v57 = vmul.f32 1.442695, %v1643_v48  ;;  %v1672_v62 = vmul.f32 1.442695, %v1671_v53  ;;  %v1526_v15 = vmul.f32 %v1525_v55, %v3016_v34 }
 0x7de   : > { %2438 = vpow2.f32 %v1560_v39  ;;  %v1700_v11 = vmul.f32 1.442695, %v1699_v46  ;;  %v1728_v13 = vmul.f32 1.442695, %v1727_v58  ;;  %v1555_v14 = vmul.f32 1.442695, %v1554_v63 }
 0x7df   : > { %2440 = vpow2.f32 %v1532_v41  ;;  %v1610_v28 = vmul.f32 %v1609_v50, %v3016_v34  ;;  %v1527_v29 = vmul.f32 1.442695, %v1526_v15  ;;  %v1582_v30 = vmul.f32 %v1581_v56, %v3016_v34 }
 0x7e0   : > { %2442 = vpow2.f32 %v1588_v47  ;;  %v1666_v26 = vmul.f32 %v1665_v12, %v3016_v34  ;;  %v1721_v36 = vstv %s3047_s23  ;;  %v1638_v40 = vmul.f32 %v1637_v33, %v3016_v34  ;;  %s1970_s23 = sld [smem:[#allocation7 + $0x2]] }
 0x7e1   : > { %2444 = vpow2.f32 %v1616_v52  ;;  %v1611_v6 = vmul.f32 1.442695, %v1610_v28  ;;  %v1583_v39 = vmul.f32 1.442695, %v1582_v30  ;;  %v1693_v42 = vstv %s3056_s21  ;;  %s1974_s21 = sld [smem:[#allocation7 + $0x3]] }
 0x7e2   : > { %2446 = vpow2.f32 %v1644_v57  ;;  %v1722_v44 = vmul.f32 %v1721_v36, %v3016_v34  ;;  %v1667_v48 = vmul.f32 1.442695, %v1666_v26  ;;  %v1639_v49 = vmul.f32 1.442695, %v1638_v40 }
 0x7e3   : > { %2448 = vpow2.f32 %v1672_v62  ;;  %v1694_v52 = vmul.f32 %v1693_v42, %v3016_v34  ;;  %v1717_v28 = vstv %s1987_s30  ;;  %v1745_v33 = vstv %s1991_s28  ;;  %s718_s28 = scalar_lea.vmem %s3117_s19, %s2774_s2 }
 0x7e4   : > { %2450 = vpow2.f32 %v1700_v11  ;;  %v1723_v50 = vmul.f32 1.442695, %v1722_v44  ;;  %v1752_v40 = vstv %s1992_s27  ;;  %s722_s27 = scalar_lea.vmem %s3118_s20, %s2774_s2 }
 0x7e5   : > { %2452 = vpow2.f32 %v1728_v13  ;;  %v1695_v56 = vmul.f32 1.442695, %v1694_v52 }
 0x7e6   : > { %2454 = vpow2.f32 %v1555_v14  ;;  %v1605_v14 = vstv %s1971_s25  ;;  %s1986_s25 = sld [smem:[#allocation7 + $0x6]] }
 0x7e7   : > { %2456 = vpow2.f32 %v1527_v29 }
 0x7e8   : > { %v2439_v16 = vpop.eup %2438  ;;  %2458 = vpow2.f32 %v1611_v6 }
 0x7e9   : > { %v2441_v21 = vpop.eup %2440  ;;  %2460 = vpow2.f32 %v1583_v39 }
 0x7ea   : > { %v2443_v32 = vpop.eup %2442  ;;  %2462 = vpow2.f32 %v1667_v48 }
 0x7eb   : > { %v2445_v35 = vpop.eup %2444  ;;  %2464 = vpow2.f32 %v1639_v49  ;;  %v1626_v49 = vstv %s1974_s21 }
 0x7ec   : > { %v2447_v41 = vpop.eup %2446  ;;  %2466 = vpow2.f32 %v1723_v50 }
 0x7ed   : > { %v2449_v43 = vpop.eup %2448  ;;  %2468 = vpow2.f32 %v1695_v56 }
 0x7ee   : > { %v2451_v53 = vpop.eup %2450 }
 0x7ef   : > { %v2453_v54 = vpop.eup %2452 }
 0x7f0   : > { %v2455_v57 = vpop.eup %2454 }
 0x7f1   : > { %v2457_v46 = vpop.eup %2456 }
 0x7f2   : > { %v2459_v34 = vpop.eup %2458 }
 0x89e   : > { %v1510_v60 = vpop.f32.mrb[6].mxu1 }
 0x89f   : > { %v1511_v0 = vadd.f32 %v1510_v60, %v1439_v59  ;;  %v2088_v1 = vpop.f32.mrb[7].mxu1  ;;  %v2461_v60 = vpop.eup %2460 }
 0x8a0   : > { %v2463_v63 = vpop.eup %2462 }
 0x8a1   : > { %v1514_v10 = vmul.f32 %v2795_v51, %v1511_v0  ;;  %v2465_v0 = vpop.eup %2464 }
 0x8a3   : > { %v1566_v17 = vrot.slane %v1514_v10, %v1565_v61  ;;  %v1538_v18 = vrot.slane %v1514_v10, %v1537_v2  ;;  %v3052_v19 = vrot.slane %v1514_v10, %v1593_v3  ;;  %v3054_v20 = vrot.slane %v1514_v10, %v1621_v4  ;;  %v2467_v3 = vpop.eup %2466 }
 0x8a4   : > { %v3058_v51 = vrot.slane %v1514_v10, %v1649_v5  ;;  %v3060_v22 = vrot.slane %v1514_v10, %v1677_v7  ;;  %v3062_v23 = vrot.slane %v1514_v10, %v1705_v8  ;;  %v3064_v24 = vrot.slane %v1514_v10, %v1733_v9  ;;  %v2469_v4 = vpop.eup %2468 }
 0x8a5   : > { %v1574_v25 = vmul.f32 %v2439_v16, %v1566_v17  ;;  %v1546_v27 = vmul.f32 %v2441_v21, %v1538_v18  ;;  %v1602_v37 = vmul.f32 %v2443_v32, %v3052_v19  ;;  %v1630_v38 = vmul.f32 %v2445_v35, %v3054_v20 }
 0x8a6   : > { %v1658_v45 = vmul.f32 %v2447_v41, %v3058_v51  ;;  %v1686_v47 = vmul.f32 %v2449_v43, %v3060_v22  ;;  %v1714_v31 = vmul.f32 %v2451_v53, %v3062_v23  ;;  %v1742_v55 = vmul.f32 %v2453_v54, %v3064_v24 }
 0x8a7   : > { %1575 = vadd.xlane.f32.xlu0 %v1574_v25  ;;  %1547 = vadd.xlane.f32.xlu1 %v1546_v27  ;;  %v1567_v58 = vmul.f32 %v2455_v57, %v1566_v17  ;;  %v1539_v59 = vmul.f32 %v2457_v46, %v1538_v18  ;;  %v1623_v61 = vmul.f32 %v2459_v34, %v3054_v20  ;;  %v1577_v8 = vstv %s1967_s1  ;;  %s1978_s1 = sld [smem:[#allocation7 + $0x4]] }
 0x8a8   : > { %v1595_v62 = vmul.f32 %v2461_v60, %v3052_v19  ;;  %v1679_v1 = vmul.f32 %v2463_v63, %v3060_v22  ;;  %v1651_v2 = vmul.f32 %v2465_v0, %v3058_v51  ;;  %v1735_v5 = vmul.f32 %v2467_v3, %v3064_v24 }
 0x8a9   : > { %v1707_v7 = vmul.f32 %v2469_v4, %v3062_v23  ;;  %v1549_v9 = vstv %s1963_s26  ;;  %v1633_v16 = vstv %s1975_s4  ;;  %v1661_v20 = vstv %s1979_s0  ;;  %s1982_s26 = sld [smem:[#allocation7 + $0x5]]  ;;  %s1990_s4 = sld [smem:[#allocation7 + $0x7]] }
 0x8aa   : > { %v1689_v23 = vstv %s1983_s3  ;;  %s1748_s0 = sld [smem:[#allocation8]] }
 0x8ab   : > { %1603 = vadd.xlane.f32.xlu0 %v1602_v37  ;;  %1631 = vadd.xlane.f32.xlu1 %v1630_v38  ;;  %v1570_v37 = vstv %s1966_s29  ;;  %v1542_v38 = vstv %s1534_s22 }
 0x8ad   : > { %v1654_v50 = vstv %s1978_s1 }
 0x8af   : > { %1659 = vadd.xlane.f32.xlu0 %v1658_v45  ;;  %1687 = vadd.xlane.f32.xlu1 %v1686_v47  ;;  %v1598_v47 = vstv %s1970_s23 }
 0x8b3   : > { %1715 = vadd.xlane.f32.xlu0 %v1714_v31  ;;  %1743 = vadd.xlane.f32.xlu1 %v1742_v55 }
 0x8b7   : > { %1568 = vadd.xlane.f32.xlu1 %v1567_v58  ;;  %1540 = vadd.xlane.f32.xlu0 %v1539_v59  ;;  %v1682_v58 = vstv %s1982_s26 }
 0x8bb   : > { %1624 = vadd.xlane.f32.xlu1 %v1623_v61  ;;  %1596 = vadd.xlane.f32.xlu0 %v1595_v62  ;;  %v1710_v62 = vstv %s1986_s25 }
 0x8bf   : > { %1680 = vadd.xlane.f32.xlu1 %v1679_v1  ;;  %1652 = vadd.xlane.f32.xlu0 %v1651_v2  ;;  %v1738_v1 = vstv %s1990_s4 }
 0x8c3   : > { %1736 = vadd.xlane.f32.xlu1 %v1735_v5  ;;  %1708 = vadd.xlane.f32.xlu0 %v1707_v7 }
 0x934   : > { %v1576_v10 = vpop.xlane.xlu0 %1575  ;;  %v1548_v11 = vpop.xlane.xlu1 %1547 }
 0x935   : > { %v1578_v12 = vmul.f32 %v1577_v8, %v1576_v10  ;;  %v1550_v13 = vmul.f32 %v1549_v9, %v1548_v11  ;;  %v1749_v9 = vstv %s1748_s0 }
 0x937   : > { %v1579_v18 = vadd.f32 %v1578_v12, %v1550_v13 }
 0x938   : > { %v1604_v15 = vpop.xlane.xlu0 %1603  ;;  %v1632_v17 = vpop.xlane.xlu1 %1631 }
 0x939   : > { %v1606_v19 = vmul.f32 %v1605_v14, %v1604_v15  ;;  %v1634_v51 = vmul.f32 %v1633_v16, %v1632_v17 }
 0x93b   : > { %v1607_v21 = vadd.f32 %v1606_v19, %v1579_v18 }
 0x93c   : > { %v1660_v22 = vpop.xlane.xlu0 %1659  ;;  %v1688_v24 = vpop.xlane.xlu1 %1687 }
 0x93d   : > { %v1635_v25 = vadd.f32 %v1634_v51, %v1607_v21  ;;  %v1662_v27 = vmul.f32 %v1661_v20, %v1660_v22  ;;  %v1690_v30 = vmul.f32 %v1689_v23, %v1688_v24 }
 0x93f   : > { %v1663_v29 = vadd.f32 %v1662_v27, %v1635_v25 }
 0x940   : > { %v1716_v32 = vpop.xlane.xlu0 %1715  ;;  %v1744_v35 = vpop.xlane.xlu1 %1743 }
 0x941   : > { %v1691_v26 = vadd.f32 %v1690_v30, %v1663_v29  ;;  %v1718_v36 = vmul.f32 %v1717_v28, %v1716_v32  ;;  %v1746_v39 = vmul.f32 %v1745_v33, %v1744_v35 }
 0x943   : > { %v1719_v6 = vadd.f32 %v1718_v36, %v1691_v26 }
 0x944   : > { %v1569_v41 = vpop.xlane.xlu1 %1568  ;;  %v1541_v42 = vpop.xlane.xlu0 %1540 }
 0x945   : > { %v1747_v43 = vadd.f32 %v1746_v39, %v1719_v6  ;;  %v1571_v44 = vmul.f32 %v1570_v37, %v1569_v41  ;;  %v1543_v45 = vmul.f32 %v1542_v38, %v1541_v42 }
 0x947   : > { %v1753_v48 = vadd.f32 %v1752_v40, %v1747_v43  ;;  %v1572_v31 = vadd.f32 %v1571_v44, %v1543_v45 }
 0x948   : > { %v1625_v52 = vpop.xlane.xlu1 %1624  ;;  %v1597_v53 = vpop.xlane.xlu0 %1596 }
 0x949   : > { %v1755_v54 = vmin.f32 %v1753_v48, 20.0  ;;  %v1599_v55 = vmul.f32 %v1598_v47, %v1597_v53  ;;  %v1627_v57 = vmul.f32 %v1626_v49, %v1625_v52  ;;  %vm1754_vm15 = vcmp.gt.f32.partialorder %v1753_v48, 20.0 }
 0x94b   : > { %v1756_v56 = vmul.f32 1.442695, %v1755_v54  ;;  %v1600_v46 = vadd.f32 %v1599_v55, %v1572_v31 }
 0x94c   : > { %v1681_v59 = vpop.xlane.xlu1 %1680  ;;  %v1653_v34 = vpop.xlane.xlu0 %1652 }
 0x94d   : > { %2470 = vpow2.f32 %v1756_v56  ;;  %v1628_v60 = vadd.f32 %v1627_v57, %v1600_v46  ;;  %v1655_v61 = vmul.f32 %v1654_v50, %v1653_v34  ;;  %v1683_v63 = vmul.f32 %v1682_v58, %v1681_v59 }
 0x94f   : > { %v1656_v0 = vadd.f32 %v1655_v61, %v1628_v60 }
 0x950   : > { %v1737_v2 = vpop.xlane.xlu1 %1736  ;;  %v1709_v3 = vpop.xlane.xlu0 %1708 }
 0x951   : > { %v1684_v4 = vadd.f32 %v1683_v63, %v1656_v0  ;;  %v1711_v5 = vmul.f32 %v1710_v62, %v1709_v3  ;;  %v1739_v7 = vmul.f32 %v1738_v1, %v1737_v2 }
 0x953   : > { %v1712_v8 = vadd.f32 %v1711_v5, %v1684_v4 }
 0x955   : > { %v1740_v10 = vadd.f32 %v1739_v7, %v1712_v8 }
 0x957   : > { %v2471_v11 = vpop.eup %2470  ;;  %v1750_v12 = vadd.f32 %v1749_v9, %v1740_v10 }
 0x958   : > { %v1758_v13 = vadd.f32 1.0, %v2471_v11 }
 0x959   : > { %1763 = vst.msk [vmem:[%s718_s28] sm:$0xff] %vm1762_vm14, %v1750_v12 }
 0x95a   : > { %2472 = vlog2.f32 %v1758_v13 }
 0x964   : > { %v2473_v14 = vpop.eup %2472 }
 0x965   : > { %v1760_v15 = vmul.f32 0.6931472, %v2473_v14 }
 0x967   : > { %v1761_v16 = vsel %vm1754_vm15, %v1753_v48, %v1760_v15 }
 0x968   : > { %1764 = vst.msk [vmem:[%s722_s27] sm:$0xff] %vm1762_vm14, %v1761_v16 }
 0x969 PF: > { %s35_s24 = sadd.s32 1, %s2552_s24  }
 0x96a   : > { %p32_p2 = scmp.ge.s32.totalorder %s35_s24, 4  }
 0x96c   :  { %34 = sbr.rel (!%p32_p2) target bundleno = 12 (0xc), region = 161 }
 0x973   :  { %1798 = vsyncpa [#allocation4], 1 }
 0x974   :  { %1800 = vsyncpa [#allocation4 + $0x1], 1 }
 0x975   :  { %1801 = vsyncpa [#allocation6], 1 }
 0x976   :  { %1802 = vsyncpa [#allocation9], 1 }

</bundles_post_ra>
